<compile_context>
chip_gen: v5e
topology: v5e:2x2
jax: 0.10.0
libtpu: 0.0.40
codegen_flags: <defaults>
</compile_context>

<pallas_src>
import jax
import jax.numpy as jnp
from jax.experimental import pallas as pl
from jax.experimental.pallas import tpu as pltpu


def _round_up(x: int, m: int) -> int:
    return ((x + m - 1) // m) * m


def bpnn_kernel(x_ref, w1_ref, b1_ref, w2_ref, b2_ref, wo_ref, bo_ref, o_ref):
    """Fused MLP forward: (Linear -> tanh) -> (Linear -> relu) -> Linear.

    All operands are f32; matmuls run on the MXU with f32 accumulation.
    tanh rides on the EUP and relu on the VPU in otherwise-idle VLIW slots.
    """
    x = x_ref[...]  # f32 [T, in]

    # Hidden layer 0: Linear + Tanh
    h = jnp.dot(x, w1_ref[...], preferred_element_type=jnp.float32) + b1_ref[...]
    h = jnp.tanh(h)

    # Hidden layer 1: Linear + ReLU
    h = jnp.dot(h, w2_ref[...], preferred_element_type=jnp.float32) + b2_ref[...]
    h = jnp.maximum(h, 0.0)

    # Output layer: Linear (no activation, matching PyTorch forward()).
    out = jnp.dot(h, wo_ref[...], preferred_element_type=jnp.float32) + bo_ref[...]
    o_ref[...] = out.astype(o_ref.dtype)


def bpnn_forward(x, params, *, batch_tile=None):
    """Run the fused BPNN forward pass with a Pallas kernel.

    x:      [B, input_size] float32
    params: dict with w1 [in,h0], b1 [1,h0], w2 [h0,h1], b2 [1,h1],
            wo [h1,out], bo [1,out]  (all float32)
    """
    B, in_size = x.shape
    h0 = params["w1"].shape[1]
    h1 = params["w2"].shape[1]
    out_size = params["wo"].shape[1]

    if batch_tile is None:
        if B <= 2048:
            # Single tile: the whole network is only a few microseconds of
            # work, so per-grid-step overhead would dominate a multi-step grid.
            batch_tile = _round_up(max(B, 16), 16)
        else:
            # >= 2 tiles so dimension_semantics="parallel" can shard batch
            # steps across the 2 TensorCores on v7x; cap at 4096 rows (tiny
            # VMEM footprint even double-buffered on every generation).
            batch_tile = min(4096, _round_up(pl.cdiv(B, 2), 256))
    batch_tile = _round_up(batch_tile, 16)  # full sublane pack

    # Pad batch to a multiple of the tile (no divisibility requirement on B).
    num_tiles = pl.cdiv(B, batch_tile)
    B_pad = num_tiles * batch_tile
    x_p = x if B_pad == B else jnp.pad(x, ((0, B_pad - B), (0, 0)))

    def resident(arr):
        # Whole-array block with a constant index_map: DMA'd once, stays
        # resident in VMEM across all grid steps.
        return pl.BlockSpec(arr.shape, lambda i: (0,) * arr.ndim)

    flops = 2 * B_pad * (in_size * h0 + h0 * h1 + h1 * out_size)
    bytes_accessed = 4 * (
        B_pad * in_size + B_pad * out_size
        + in_size * h0 + h0 + h0 * h1 + h1 + h1 * out_size + out_size
    )

    out = pl.pallas_call(
        bpnn_kernel,
        out_shape=jax.ShapeDtypeStruct((B_pad, out_size), jnp.float32),
        grid_spec=pltpu.PrefetchScalarGridSpec(
            num_scalar_prefetch=0,
            grid=(num_tiles,),
            in_specs=[
                pl.BlockSpec((batch_tile, in_size), lambda i: (i, 0)),  # x tile
                resident(params["w1"]), resident(params["b1"]),
                resident(params["w2"]), resident(params["b2"]),
                resident(params["wo"]), resident(params["bo"]),
            ],
            # Output block spans the full (unpadded) row width: writeback is a
            # single contiguous [tile, out_size] f32 chunk per grid step.
            out_specs=pl.BlockSpec((batch_tile, out_size), lambda i: (i, 0)),
        ),
        compiler_params=pltpu.CompilerParams(
            dimension_semantics=("parallel",),  # batch steps shard across TCs (v7x)
        ),
        cost_estimate=pl.CostEstimate(
            flops=flops,
            transcendentals=B_pad * h0,  # tanh
            bytes_accessed=bytes_accessed,
        ),
    )(x_p, params["w1"], params["b1"], params["w2"], params["b2"],
      params["wo"], params["bo"])

    return out[:B] if B_pad != B else out


def init_params(key, input_size, hidden_nodes, output_size):
    """Deterministic init mimicking nn.Linear default (uniform(-1/sqrt(fan_in), ...))."""
    dims = [input_size] + list(hidden_nodes) + [output_size]
    names = ["1", "2", "o"]
    params = {}
    for name, (fan_in, fan_out) in zip(names, zip(dims[:-1], dims[1:])):
        key, kw, kb = jax.random.split(key, 3)
        bound = 1.0 / (fan_in ** 0.5)
        params[f"w{name}"] = jax.random.uniform(
            kw, (fan_in, fan_out), jnp.float32, -bound, bound
        )
        params[f"b{name}"] = jax.random.uniform(
            kb, (1, fan_out), jnp.float32, -bound, bound
        )
    return params


def bpnn_reference(x, params):
    """Pure-JAX f32 reference (highest matmul precision) for correctness checking."""
    hp = jax.lax.Precision.HIGHEST
    h = jnp.tanh(jnp.dot(x, params["w1"], precision=hp) + params["b1"])
    h = jnp.maximum(jnp.dot(h, params["w2"], precision=hp) + params["b2"], 0.0)
    return jnp.dot(h, params["wo"], precision=hp) + params["bo"]


# TODO(synk): the criterion/optimizer/train loop/test-metrics/plot utilities of
# the PyTorch module are host-side training code, not part of forward(); only
# the forward pass is implemented as a Pallas kernel.

if __name__ == "__main__":
    input_size = 16
    hidden_nodes = [32, 32]
    output_size = 8
    batch = 1000  # deliberately NOT a multiple of 16/256 (exercises padding)

    key = jax.random.PRNGKey(0)
    key, kx = jax.random.split(key)
    x = jax.random.normal(kx, (batch, input_size), dtype=jnp.float32)
    params = init_params(key, input_size, hidden_nodes, output_size)

    ref = bpnn_reference(x, params)

    # Default tiling: single 1008-row tile (overhead-minimal path).
    out = jax.block_until_ready(bpnn_forward(x, params))
    assert out.shape == (batch, output_size)
    assert jnp.allclose(out, ref, atol=1e-4, rtol=1e-4), "mismatch (single-tile)"

    # Explicit small tile: 4-step grid (exercises pipelining / multi-tile path).
    out_tiled = jax.block_until_ready(bpnn_forward(x, params, batch_tile=256))
    assert out_tiled.shape == (batch, output_size)
    assert jnp.allclose(out_tiled, ref, atol=1e-4, rtol=1e-4), "mismatch (multi-tile)"

    print("KERNEL_OK")
</pallas_src>

<mosaic_0001>
module attributes {stable_mosaic.version = 11 : i64} {
  func.func @bpnn_kernel(%arg0: i32, %arg1: memref<1008x16xf32, #tpu.memory_space<vmem>>, %arg2: memref<16x32xf32, #tpu.memory_space<vmem>>, %arg3: memref<1x32xf32, #tpu.memory_space<vmem>>, %arg4: memref<32x32xf32, #tpu.memory_space<vmem>>, %arg5: memref<1x32xf32, #tpu.memory_space<vmem>>, %arg6: memref<32x8xf32, #tpu.memory_space<vmem>>, %arg7: memref<1x8xf32, #tpu.memory_space<vmem>>, %arg8: memref<1008x8xf32, #tpu.memory_space<vmem>>) attributes {dimension_semantics = [#tpu.dimension_semantics<parallel>], iteration_bounds = array<i64: 1>, scalar_prefetch = 0 : i64, scratch_operands = 0 : i64, tpu.core_type = #tpu.core_type<tc>, window_params = [{transform_indices = @transform_0, window_bounds = array<i64: 1008, 16>}, {pipeline_mode = #tpu.pipeline_mode<synchronous>, transform_indices = @transform_1, window_bounds = array<i64: 16, 32>}, {pipeline_mode = #tpu.pipeline_mode<synchronous>, transform_indices = @transform_2, window_bounds = array<i64: 1, 32>}, {pipeline_mode = #tpu.pipeline_mode<synchronous>, transform_indices = @transform_3, window_bounds = array<i64: 32, 32>}, {pipeline_mode = #tpu.pipeline_mode<synchronous>, transform_indices = @transform_4, window_bounds = array<i64: 1, 32>}, {pipeline_mode = #tpu.pipeline_mode<synchronous>, transform_indices = @transform_5, window_bounds = array<i64: 32, 8>}, {pipeline_mode = #tpu.pipeline_mode<synchronous>, transform_indices = @transform_6, window_bounds = array<i64: 1, 8>}, {transform_indices = @transform_7, window_bounds = array<i64: 1008, 8>}]} {
    %c0 = arith.constant 0 : index
    %c0_0 = arith.constant 0 : index
    %0 = vector.load %arg1[%c0, %c0_0] : memref<1008x16xf32, #tpu.memory_space<vmem>>, vector<1008x16xf32>
    %c0_1 = arith.constant 0 : index
    %c0_2 = arith.constant 0 : index
    %1 = vector.load %arg2[%c0_1, %c0_2] : memref<16x32xf32, #tpu.memory_space<vmem>>, vector<16x32xf32>
    %cst = arith.constant dense<0.000000e+00> : vector<1008x32xf32>
    %2 = tpu.matmul %0, %1, %cst {dimension_numbers = #tpu.dot_dimension_numbers<[1], [0], [0], [1], [0, 0, 1, 1], [], []>} : vector<1008x16xf32>, vector<16x32xf32>, vector<1008x32xf32> -> vector<1008x32xf32>
    %c0_3 = arith.constant 0 : index
    %c0_4 = arith.constant 0 : index
    %3 = vector.load %arg3[%c0_3, %c0_4] : memref<1x32xf32, #tpu.memory_space<vmem>>, vector<1x32xf32>
    %4 = vector.broadcast %3 : vector<1x32xf32> to vector<1008x32xf32>
    %5 = arith.addf %2, %4 : vector<1008x32xf32>
    %6 = math.tanh %5 : vector<1008x32xf32>
    %c0_5 = arith.constant 0 : index
    %c0_6 = arith.constant 0 : index
    %7 = vector.load %arg4[%c0_5, %c0_6] : memref<32x32xf32, #tpu.memory_space<vmem>>, vector<32x32xf32>
    %cst_7 = arith.constant dense<0.000000e+00> : vector<1008x32xf32>
    %8 = tpu.matmul %6, %7, %cst_7 {dimension_numbers = #tpu.dot_dimension_numbers<[1], [0], [0], [1], [0, 0, 1, 1], [], []>} : vector<1008x32xf32>, vector<32x32xf32>, vector<1008x32xf32> -> vector<1008x32xf32>
    %c0_8 = arith.constant 0 : index
    %c0_9 = arith.constant 0 : index
    %9 = vector.load %arg5[%c0_8, %c0_9] : memref<1x32xf32, #tpu.memory_space<vmem>>, vector<1x32xf32>
    %10 = vector.broadcast %9 : vector<1x32xf32> to vector<1008x32xf32>
    %11 = arith.addf %8, %10 : vector<1008x32xf32>
    %cst_10 = arith.constant 0.000000e+00 : f32
    %12 = vector.broadcast %cst_10 : f32 to vector<1008x32xf32>
    %13 = arith.maximumf %11, %12 : vector<1008x32xf32>
    %c0_11 = arith.constant 0 : index
    %c0_12 = arith.constant 0 : index
    %14 = vector.load %arg6[%c0_11, %c0_12] : memref<32x8xf32, #tpu.memory_space<vmem>>, vector<32x8xf32>
    %cst_13 = arith.constant dense<0.000000e+00> : vector<1008x8xf32>
    %15 = tpu.matmul %13, %14, %cst_13 {dimension_numbers = #tpu.dot_dimension_numbers<[1], [0], [0], [1], [0, 0, 1, 1], [], []>} : vector<1008x32xf32>, vector<32x8xf32>, vector<1008x8xf32> -> vector<1008x8xf32>
    %c0_14 = arith.constant 0 : index
    %c0_15 = arith.constant 0 : index
    %16 = vector.load %arg7[%c0_14, %c0_15] : memref<1x8xf32, #tpu.memory_space<vmem>>, vector<1x8xf32>
    %17 = vector.broadcast %16 : vector<1x8xf32> to vector<1008x8xf32>
    %18 = arith.addf %15, %17 : vector<1008x8xf32>
    %c0_16 = arith.constant 0 : index
    %c0_17 = arith.constant 0 : index
    %19 = vector.load %arg8[%c0_16, %c0_17] : memref<1008x8xf32, #tpu.memory_space<vmem>>, vector<1008x8xf32>
    tpu.vector_store %arg8[%c0_16, %c0_17], %18 {strides = array<i32>} : memref<1008x8xf32, #tpu.memory_space<vmem>>, vector<1008x8xf32>,
    return
  }
  func.func @transform_0(%arg0: i32) -> (i32, i32) {
    %c0_i32 = arith.constant 0 : i32
    %c0_i32_0 = arith.constant 0 : i32
    return %arg0, %c0_i32 : i32, i32
  }
  func.func @transform_1(%arg0: i32) -> (i32, i32) {
    %c0_i32 = arith.constant 0 : i32
    %c0_i32_0 = arith.constant 0 : i32
    %c0_i32_1 = arith.constant 0 : i32
    return %c0_i32, %c0_i32_0 : i32, i32
  }
  func.func @transform_2(%arg0: i32) -> (i32, i32) {
    %c0_i32 = arith.constant 0 : i32
    %c0_i32_0 = arith.constant 0 : i32
    %c0_i32_1 = arith.constant 0 : i32
    return %c0_i32, %c0_i32_0 : i32, i32
  }
  func.func @transform_3(%arg0: i32) -> (i32, i32) {
    %c0_i32 = arith.constant 0 : i32
    %c0_i32_0 = arith.constant 0 : i32
    %c0_i32_1 = arith.constant 0 : i32
    return %c0_i32, %c0_i32_0 : i32, i32
  }
  func.func @transform_4(%arg0: i32) -> (i32, i32) {
    %c0_i32 = arith.constant 0 : i32
    %c0_i32_0 = arith.constant 0 : i32
    %c0_i32_1 = arith.constant 0 : i32
    return %c0_i32, %c0_i32_0 : i32, i32
  }
  func.func @transform_5(%arg0: i32) -> (i32, i32) {
    %c0_i32 = arith.constant 0 : i32
    %c0_i32_0 = arith.constant 0 : i32
    %c0_i32_1 = arith.constant 0 : i32
    return %c0_i32, %c0_i32_0 : i32, i32
  }
  func.func @transform_6(%arg0: i32) -> (i32, i32) {
    %c0_i32 = arith.constant 0 : i32
    %c0_i32_0 = arith.constant 0 : i32
    %c0_i32_1 = arith.constant 0 : i32
    return %c0_i32, %c0_i32_0 : i32, i32
  }
  func.func @transform_7(%arg0: i32) -> (i32, i32) {
    %c0_i32 = arith.constant 0 : i32
    %c0_i32_0 = arith.constant 0 : i32
    return %arg0, %c0_i32 : i32, i32
  }
}

</mosaic_0001>

<bundles_post_ra>
// kernel: tpu_custom_call.1
= control target key start
LH: loop header
LB: loop body
LE: loop exit
PB: predicated region body
PF: predicated region fallthrough
CT: control target
= control target key end

     0   :  { %vm158_vm0 = vcmask 130048   ;;  %vm1066_vm1 = vcmask 261120   ;;  %vm2747_vm2 = vcmask 64512   ;;  %s5466_s1 = inlined_call_operand.vmem [shape: f32[16,32], index: 1, kind: input, shape index: {}]   ;;  %s5467_s0 = inlined_call_operand.vmem [shape: f32[1008,16], index: 0, kind: input, shape index: {}]   ;;  %s5468_s2 = inlined_call_operand.vmem [shape: f32[1,32], index: 2, kind: input, shape index: {}]   ;;  %s5469_s3 = inlined_call_operand.vmem [shape: f32[32,32], index: 3, kind: input, shape index: {}]   ;;  %s5470_s4 = inlined_call_operand.vmem [shape: f32[1,32], index: 4, kind: input, shape index: {}]   ;;  %s5471_s5 = inlined_call_operand.vmem [shape: f32[32,8], index: 5, kind: input, shape index: {}]   ;;  %s5472_s6 = inlined_call_operand.vmem [shape: f32[1,8], index: 6, kind: input, shape index: {}]   ;;  %s5473_s7 = inlined_call_operand.vmem [shape: f32[1008,8], index: 7, kind: output, shape index: {}]  }
   0x1   :  { %v153_v0 = vld [vmem:[%s5466_s1 + $0x8] sm:$0xff]  ;;  %v152_v1 = vld [vmem:[%s5466_s1] sm:$0xff]  ;;  %v28_v4 = vld [vmem:[%s5467_s0 + $0x10] sm:$0xff] }
   0x2   :  { %551 = vmatpush.msra.mxu0 %v153_v0  ;;  %v26_v2 = vld [vmem:[%s5467_s0] sm:$0xff]  ;;  %3256 = vmatpush.msra.mxu3 %v153_v0  ;;  %v27_v3 = vld [vmem:[%s5467_s0 + $0x8] sm:$0xff]  ;;  %v29_v5 = vld [vmem:[%s5467_s0 + $0x18] sm:$0xff] }
   0x3   :  { %v121_v6 = vld [vmem:[%s5467_s0 + $0x2f8] sm:$0xff]  ;;  %v30_v7 = vld [vmem:[%s5467_s0 + $0x20] sm:$0xff]  ;;  %v31_v9 = vld [vmem:[%s5467_s0 + $0x28] sm:$0xff] }
   0x4   :  { %552 = vmatpush.msra.mxu0 %v152_v1  ;;  %3257 = vmatpush.msra.mxu3 %v152_v1  ;;  %v122_v8 = vld [vmem:[%s5467_s0 + $0x300] sm:$0xff]  ;;  %v123_v10 = vld [vmem:[%s5467_s0 + $0x308] sm:$0xff]  ;;  %v32_v11 = vld [vmem:[%s5467_s0 + $0x30] sm:$0xff] }
   0x5   :  { %2878 = vmatmul.msk.f32.vlgmr.msra.gmra.mxu0 %vm158_vm0, %v26_v2  ;;  %2973 = vmatmul.msk.f32.vlgmr.msra.gmra.mxu3 %vm158_vm0, %v121_v6  ;;  %v124_v12 = vld [vmem:[%s5467_s0 + $0x310] sm:$0xff]  ;;  %v33_v13 = vld [vmem:[%s5467_s0 + $0x38] sm:$0xff]  ;;  %v34_v15 = vld [vmem:[%s5467_s0 + $0x40] sm:$0xff] }
   0x6   :  { %v125_v14 = vld [vmem:[%s5467_s0 + $0x318] sm:$0xff]  ;;  %v126_v16 = vld [vmem:[%s5467_s0 + $0x320] sm:$0xff]  ;;  %v35_v17 = vld [vmem:[%s5467_s0 + $0x48] sm:$0xff] }
   0x7   :  { %v127_v18 = vld [vmem:[%s5467_s0 + $0x328] sm:$0xff]  ;;  %v36_v19 = vld [vmem:[%s5467_s0 + $0x50] sm:$0xff]  ;;  %v37_v21 = vld [vmem:[%s5467_s0 + $0x58] sm:$0xff] }
   0x8   :  { %v128_v20 = vld [vmem:[%s5467_s0 + $0x330] sm:$0xff]  ;;  %v38_v22 = vld [vmem:[%s5467_s0 + $0x60] sm:$0xff]  ;;  %v129_v23 = vld [vmem:[%s5467_s0 + $0x338] sm:$0xff] }
   0x9   :  { %v1061_v24 = vld [vmem:[%s5469_s3 + $0x18] sm:$0xff]  ;;  %v1060_v25 = vld [vmem:[%s5469_s3 + $0x10] sm:$0xff]  ;;  %v1059_v26 = vld [vmem:[%s5469_s3 + $0x8] sm:$0xff] }
   0xa   :  { %1457 = vmatpush.msra.mxu1 %v1061_v24  ;;  %3258 = vmatpush.msrb.mxu3 %v1061_v24  ;;  %v39_v27 = vld [vmem:[%s5467_s0 + $0x68] sm:$0xff]  ;;  %v130_v28 = vld [vmem:[%s5467_s0 + $0x340] sm:$0xff]  ;;  %v40_v30 = vld [vmem:[%s5467_s0 + $0x70] sm:$0xff] }
   0xb   :  { %v1058_v29 = vld [vmem:[%s5469_s3] sm:$0xff]  ;;  %v131_v31 = vld [vmem:[%s5467_s0 + $0x348] sm:$0xff]  ;;  %v41_v32 = vld [vmem:[%s5467_s0 + $0x78] sm:$0xff] }
   0xc   :  { %1458 = vmatpush.msra.mxu1 %v1060_v25  ;;  %3259 = vmatpush.msrb.mxu3 %v1060_v25  ;;  %v132_v33 = vld [vmem:[%s5467_s0 + $0x350] sm:$0xff]  ;;  %v3700_v34 = vld [vmem:[%s5468_s2] ss:$0 sm:$0xff]  ;;  %v133_v37 = vld [vmem:[%s5467_s0 + $0x358] sm:$0xff] }
   0xd   :  { %2879 = vmatmul.msk.f32.gmra.mxu0 %vm158_vm0, %v27_v3  ;;  %2974 = vmatmul.msk.f32.gmra.mxu3 %vm158_vm0, %v122_v8  ;;  %v42_v36 = vld [vmem:[%s5467_s0 + $0x80] sm:$0xff]  ;;  %v43_v40 = vld [vmem:[%s5467_s0 + $0x88] sm:$0xff]  ;;  %v44_v45 = vld [vmem:[%s5467_s0 + $0x90] sm:$0xff] }
   0xe   :  { %1459 = vmatpush.msra.mxu1 %v1059_v26  ;;  %3260 = vmatpush.msrb.mxu3 %v1059_v26  ;;  %v134_v41 = vld [vmem:[%s5467_s0 + $0x360] sm:$0xff]  ;;  %v135_v46 = vld [vmem:[%s5467_s0 + $0x368] sm:$0xff]  ;;  %v45_v50 = vld [vmem:[%s5467_s0 + $0x98] sm:$0xff] }
   0xf   :  { %v136_v51 = vld [vmem:[%s5467_s0 + $0x370] sm:$0xff]  ;;  %v46_v55 = vld [vmem:[%s5467_s0 + $0xa0] sm:$0xff]  ;;  %v137_v56 = vld [vmem:[%s5467_s0 + $0x378] sm:$0xff] }
  0x10   :  { %1460 = vmatpush.msra.mxu1 %v1058_v29  ;;  %3261 = vmatpush.msrb.mxu3 %v1058_v29  ;;  %v47_v61 = vld [vmem:[%s5467_s0 + $0xa8] sm:$0xff]  ;;  %v138_v62 = vld [vmem:[%s5467_s0 + $0x380] sm:$0xff]  ;;  %v48_v3 = vld [vmem:[%s5467_s0 + $0xb0] sm:$0xff] }
  0x15   :  { %2880 = vmatmul.msk.f32.gmra.mxu0 %vm158_vm0, %v28_v4  ;;  %2975 = vmatmul.msk.f32.gmra.mxu3 %vm158_vm0, %v123_v10  ;;  %v139_v4 = vld [vmem:[%s5467_s0 + $0x388] sm:$0xff]  ;;  %v140_v10 = vld [vmem:[%s5467_s0 + $0x390] sm:$0xff] }
  0x1d   :  { %2881 = vmatmul.msk.f32.gmra.mxu0 %vm158_vm0, %v29_v5  ;;  %2976 = vmatmul.msk.f32.gmra.mxu3 %vm158_vm0, %v124_v12 }
  0x25   :  { %2882 = vmatmul.msk.f32.gmra.mxu0 %vm158_vm0, %v30_v7  ;;  %2977 = vmatmul.msk.f32.gmra.mxu3 %vm158_vm0, %v125_v14 }
  0x2d   :  { %2883 = vmatmul.msk.f32.gmra.mxu0 %vm158_vm0, %v31_v9  ;;  %2978 = vmatmul.msk.f32.gmra.mxu3 %vm158_vm0, %v126_v16  ;;  %v49_v9 = vld [vmem:[%s5467_s0 + $0xb8] sm:$0xff] }
  0x2e   :  { %v141_v16 = vld [vmem:[%s5467_s0 + $0x398] sm:$0xff] }
  0x35   :  { %2884 = vmatmul.msk.f32.gmra.mxu0 %vm158_vm0, %v32_v11  ;;  %2979 = vmatmul.msk.f32.gmra.mxu3 %vm158_vm0, %v127_v18 }
  0x3d   :  { %2885 = vmatmul.msk.f32.gmra.mxu0 %vm158_vm0, %v33_v13  ;;  %2980 = vmatmul.msk.f32.gmra.mxu3 %vm158_vm0, %v128_v20 }
  0x45   :  { %2886 = vmatmul.msk.f32.gmra.mxu0 %vm158_vm0, %v34_v15  ;;  %2981 = vmatmul.msk.f32.gmra.mxu3 %vm158_vm0, %v129_v23  ;;  %v50_v15 = vld [vmem:[%s5467_s0 + $0xc0] sm:$0xff] }
  0x4d   :  { %2887 = vmatmul.msk.f32.gmra.mxu0 %vm158_vm0, %v35_v17  ;;  %2982 = vmatmul.msk.f32.gmra.mxu3 %vm158_vm0, %v130_v28  ;;  %v143_v28 = vld [vmem:[%s5467_s0 + $0x3a8] sm:$0xff] }
  0x55   :  { %2888 = vmatmul.msk.f32.gmra.mxu0 %vm158_vm0, %v36_v19  ;;  %2983 = vmatmul.msk.f32.gmra.mxu3 %vm158_vm0, %v131_v31 }
  0x5d   :  { %2889 = vmatmul.msk.f32.gmra.mxu0 %vm158_vm0, %v37_v21  ;;  %2984 = vmatmul.msk.f32.gmra.mxu3 %vm158_vm0, %v132_v33  ;;  %v51_v21 = vld [vmem:[%s5467_s0 + $0xc8] sm:$0xff]  ;;  %v53_v33 = vld [vmem:[%s5467_s0 + $0xd8] sm:$0xff] }
  0x65   :  { %2890 = vmatmul.msk.f32.gmra.mxu0 %vm158_vm0, %v38_v22  ;;  %2985 = vmatmul.msk.f32.gmra.mxu3 %vm158_vm0, %v133_v37  ;;  %v142_v22 = vld [vmem:[%s5467_s0 + $0x3a0] sm:$0xff] }
  0x6d   :  { %2891 = vmatmul.msk.f32.gmra.mxu0 %vm158_vm0, %v39_v27  ;;  %2986 = vmatmul.msk.f32.gmra.mxu3 %vm158_vm0, %v134_v41  ;;  %v52_v27 = vld [vmem:[%s5467_s0 + $0xd0] sm:$0xff]  ;;  %v145_v41 = vld [vmem:[%s5467_s0 + $0x3b8] sm:$0xff] }
  0x75   :  { %2892 = vmatmul.msk.f32.gmra.mxu0 %vm158_vm0, %v40_v30  ;;  %2987 = vmatmul.msk.f32.gmra.mxu3 %vm158_vm0, %v135_v46  ;;  %v1968_v46 = vld [vmem:[%s5471_s5 + $0x10] sm:$0xff] }
  0x7d   :  { %2893 = vmatmul.msk.f32.gmra.mxu0 %vm158_vm0, %v41_v32  ;;  %2988 = vmatmul.msk.f32.gmra.mxu3 %vm158_vm0, %v136_v51 }
  0x82   :  { %v554_v35 = vpop.f32.mrf.mxu0 }
  0x83   :  { %v555_v38 = vadd.f32 %v3700_v34, %v554_v35  ;;  %v144_v35 = vld [vmem:[%s5467_s0 + $0x3b0] sm:$0xff] }
  0x85   :  { %3269 = vtanh.f32 %v555_v38  ;;  %2894 = vmatmul.msk.f32.gmra.mxu0 %vm158_vm0, %v42_v36  ;;  %2989 = vmatmul.msk.f32.gmra.mxu3 %vm158_vm0, %v137_v56  ;;  %v56_v56 = vld [vmem:[%s5467_s0 + $0xf0] sm:$0xff] }
  0x88   :  { %v3751_v59 = vpop.f32.mrf.mxu3 }
  0x8a   :  { %v557_v39 = vpop.f32.mrf.mxu0 }
  0x8b   :  { %v3270_v42 = vpop.eup %3269  ;;  %v558_v43 = vadd.f32 %v3700_v34, %v557_v39 }
  0x8c   :  { %3004 = vmatmul.msk.f32.vlgmr.msra.gmra.mxu1 %vm1066_vm1, %v3270_v42 }
  0x8d   :  { %3271 = vtanh.f32 %v558_v43  ;;  %2895 = vmatmul.msk.f32.gmra.mxu0 %vm158_vm0, %v43_v40  ;;  %2990 = vmatmul.msk.f32.gmra.mxu3 %vm158_vm0, %v138_v62  ;;  %v54_v40 = vld [vmem:[%s5467_s0 + $0xe0] sm:$0xff] }
  0x90   :  { %v3763_v1 = vpop.f32.mrf.mxu3 }
  0x92   :  { %v560_v44 = vpop.f32.mrf.mxu0 }
  0x93   :  { %v3272_v47 = vpop.eup %3271  ;;  %v561_v48 = vadd.f32 %v3700_v34, %v560_v44  ;;  %v1969_v44 = vld [vmem:[%s5471_s5 + $0x18] sm:$0xff] }
  0x94   :  { %3005 = vmatmul.msk.f32.gmra.mxu1 %vm1066_vm1, %v3272_v47  ;;  %2364 = vmatpush.msra.mxu2 %v1969_v44 }
  0x95   :  { %3273 = vtanh.f32 %v561_v48  ;;  %2896 = vmatmul.msk.f32.gmra.mxu0 %vm158_vm0, %v44_v45  ;;  %2991 = vmatmul.msk.f32.gmra.mxu3 %vm158_vm0, %v139_v4  ;;  %v55_v48 = vld [vmem:[%s5467_s0 + $0xe8] sm:$0xff] }
  0x96   :  { %3262 = vmatpush.msra.mxu3 %v1969_v44  ;;  %2365 = vmatpush.msra.mxu2 %v1968_v46 }
  0x98   :  { %v3775_v7 = vpop.f32.mrf.mxu3  ;;  %3263 = vmatpush.msra.mxu3 %v1968_v46 }
  0x99   :  { %v846_v46 = vadd.f32 %v3700_v34, %v3775_v7 }
  0x9a   :  { %v563_v49 = vpop.f32.mrf.mxu0 }
  0x9b   :  { %v3274_v52 = vpop.eup %3273  ;;  %v564_v53 = vadd.f32 %v3700_v34, %v563_v49  ;;  %v146_v49 = vld [vmem:[%s5467_s0 + $0x3c0] sm:$0xff] }
  0x9c   :  { %3006 = vmatmul.msk.f32.gmra.mxu1 %vm1066_vm1, %v3274_v52 }
  0x9d   :  { %3275 = vtanh.f32 %v564_v53  ;;  %2897 = vmatmul.msk.f32.gmra.mxu0 %vm158_vm0, %v45_v50  ;;  %2992 = vmatmul.msk.f32.gmra.mxu3 %vm158_vm0, %v140_v10  ;;  %v1967_v50 = vld [vmem:[%s5471_s5 + $0x8] sm:$0xff]  ;;  %v1966_v53 = vld [vmem:[%s5471_s5] sm:$0xff] }
  0x9e   :  { %2366 = vmatpush.msra.mxu2 %v1967_v50  ;;  %3264 = vmatpush.msra.mxu3 %v1967_v50 }
  0xa0   :  { %v3787_v13 = vpop.f32.mrf.mxu3  ;;  %2367 = vmatpush.msra.mxu2 %v1966_v53  ;;  %3265 = vmatpush.msra.mxu3 %v1966_v53 }
  0xa2   :  { %v566_v54 = vpop.f32.mrf.mxu0 }
  0xa3   :  { %v3276_v57 = vpop.eup %3275  ;;  %v567_v58 = vadd.f32 %v3700_v34, %v566_v54 }
  0xa4   :  { %3007 = vmatmul.msk.f32.gmra.mxu1 %vm1066_vm1, %v3276_v57  ;;  %v147_v57 = vld [vmem:[%s5467_s0 + $0x3c8] sm:$0xff] }
  0xa5   :  { %3277 = vtanh.f32 %v567_v58  ;;  %2898 = vmatmul.msk.f32.gmra.mxu0 %vm158_vm0, %v46_v55  ;;  %2993 = vmatmul.msk.f32.gmra.mxu3 %vm158_vm0, %v141_v16 }
  0xa8   :  { %v3799_v19 = vpop.f32.mrf.mxu3 }
  0xaa   :  { %v569_v60 = vpop.f32.mrf.mxu0 }
  0xab   :  { %v3278_v63 = vpop.eup %3277  ;;  %v570_v0 = vadd.f32 %v3700_v34, %v569_v60 }
  0xac   :  { %3008 = vmatmul.msk.f32.gmra.mxu1 %vm1066_vm1, %v3278_v63  ;;  %v57_v63 = vld [vmem:[%s5467_s0 + $0xf8] sm:$0xff] }
  0xad   :  { %3279 = vtanh.f32 %v570_v0  ;;  %2899 = vmatmul.msk.f32.gmra.mxu0 %vm158_vm0, %v47_v61  ;;  %2994 = vmatmul.msk.f32.gmra.mxu3 %vm158_vm0, %v142_v22  ;;  %v148_v0 = vld [vmem:[%s5467_s0 + $0x3d0] sm:$0xff] }
  0xb0   :  { %v3811_v25 = vpop.f32.mrf.mxu3 }
  0xb2   :  { %v572_v2 = vpop.f32.mrf.mxu0 }
  0xb3   :  { %v3280_v5 = vpop.eup %3279  ;;  %v573_v6 = vadd.f32 %v3700_v34, %v572_v2 }
  0xb4   :  { %3009 = vmatmul.msk.f32.gmra.mxu1 %vm1066_vm1, %v3280_v5 }
  0xb5   :  { %3281 = vtanh.f32 %v573_v6  ;;  %2900 = vmatmul.msk.f32.gmra.mxu0 %vm158_vm0, %v48_v3  ;;  %2995 = vmatmul.msk.f32.gmra.mxu3 %vm158_vm0, %v143_v28  ;;  %v58_v6 = vld [vmem:[%s5467_s0 + $0x100] sm:$0xff] }
  0xb8   :  { %v3823_v31 = vpop.f32.mrf.mxu3 }
  0xba   :  { %v575_v8 = vpop.f32.mrf.mxu0 }
  0xbb   :  { %v3282_v11 = vpop.eup %3281  ;;  %v576_v12 = vadd.f32 %v3700_v34, %v575_v8  ;;  %v149_v8 = vld [vmem:[%s5467_s0 + $0x3d8] sm:$0xff] }
  0xbc   :  { %3010 = vmatmul.msk.f32.gmra.mxu1 %vm1066_vm1, %v3282_v11  ;;  %v3910_v11 = vld [vmem:[%s5470_s4] ss:$0 sm:$0xff] }
  0xbd   :  { %3283 = vtanh.f32 %v576_v12  ;;  %2901 = vmatmul.msk.f32.gmra.mxu0 %vm158_vm0, %v49_v9  ;;  %2996 = vmatmul.msk.f32.gmra.mxu3 %vm158_vm0, %v144_v35  ;;  %v843_v35 = vadd.f32 %v3700_v34, %v3763_v1 }
  0xc0   :  { %v3835_v38 = vpop.f32.mrf.mxu3 }
  0xc2   :  { %v578_v14 = vpop.f32.mrf.mxu0 }
  0xc3   :  { %v3284_v17 = vpop.eup %3283  ;;  %v579_v18 = vadd.f32 %v3700_v34, %v578_v14 }
  0xc4   :  { %3011 = vmatmul.msk.f32.gmra.mxu1 %vm1066_vm1, %v3284_v17  ;;  %v59_v17 = vld [vmem:[%s5467_s0 + $0x108] sm:$0xff] }
  0xc5   :  { %3285 = vtanh.f32 %v579_v18  ;;  %2902 = vmatmul.msk.f32.gmra.mxu0 %vm158_vm0, %v50_v15  ;;  %2997 = vmatmul.msk.f32.gmra.mxu3 %vm158_vm0, %v145_v41  ;;  %v150_v18 = vld [vmem:[%s5467_s0 + $0x3e0] sm:$0xff] }
  0xc8   :  { %v3850_v45 = vpop.f32.mrf.mxu3 }
  0xca   :  { %v581_v20 = vpop.f32.mrf.mxu0 }
  0xcb   :  { %v3286_v23 = vpop.eup %3285  ;;  %v582_v24 = vadd.f32 %v3700_v34, %v581_v20 }
  0xcc   :  { %3012 = vmatmul.msk.f32.gmra.mxu1 %vm1066_vm1, %v3286_v23  ;;  %v840_v23 = vadd.f32 %v3700_v34, %v3751_v59 }
  0xcd   :  { %3287 = vtanh.f32 %v582_v24  ;;  %2903 = vmatmul.msk.f32.gmra.mxu0 %vm158_vm0, %v51_v21  ;;  %2998 = vmatmul.msk.f32.gmra.mxu3 %vm158_vm0, %v146_v49 }
  0xd0   :  { %v3871_v54 = vpop.f32.mrf.mxu3 }
  0xd2   :  { %v584_v26 = vpop.f32.mrf.mxu0 }
  0xd3   :  { %v3288_v29 = vpop.eup %3287  ;;  %v585_v30 = vadd.f32 %v3700_v34, %v584_v26 }
  0xd4   :  { %3013 = vmatmul.msk.f32.gmra.mxu1 %vm1066_vm1, %v3288_v29  ;;  %v60_v29 = vld [vmem:[%s5467_s0 + $0x110] sm:$0xff] }
  0xd5   :  { %3289 = vtanh.f32 %v585_v30  ;;  %2904 = vmatmul.msk.f32.gmra.mxu0 %vm158_vm0, %v52_v27  ;;  %2999 = vmatmul.msk.f32.gmra.mxu3 %vm158_vm0, %v147_v57  ;;  %v151_v30 = vld [vmem:[%s5467_s0 + $0x3e8] sm:$0xff] }
  0xd8   :  { %v3883_v61 = vpop.f32.mrf.mxu3 }
  0xda   :  { %v587_v32 = vpop.f32.mrf.mxu0 }
  0xdb   :  { %v3290_v36 = vpop.eup %3289  ;;  %v588_v37 = vadd.f32 %v3700_v34, %v587_v32 }
  0xdc   :  { %3014 = vmatmul.msk.f32.gmra.mxu1 %vm1066_vm1, %v3290_v36 }
  0xdd   :  { %3291 = vtanh.f32 %v588_v37  ;;  %2905 = vmatmul.msk.f32.gmra.mxu0 %vm158_vm0, %v53_v33  ;;  %3000 = vmatmul.msk.f32.gmra.mxu3 %vm158_vm0, %v148_v0  ;;  %v63_v0 = vld [vmem:[%s5467_s0 + $0x128] sm:$0xff] }
  0xe0   :  { %v3895_v4 = vpop.f32.mrf.mxu3 }
  0xe2   :  { %v590_v39 = vpop.f32.mrf.mxu0 }
  0xe3   :  { %v3292_v42 = vpop.eup %3291  ;;  %v591_v43 = vadd.f32 %v3700_v34, %v590_v39 }
  0xe4   :  { %3015 = vmatmul.msk.f32.gmra.mxu1 %vm1066_vm1, %v3292_v42  ;;  %v61_v42 = vld [vmem:[%s5467_s0 + $0x118] sm:$0xff] }
  0xe5   :  { %3293 = vtanh.f32 %v591_v43  ;;  %2906 = vmatmul.msk.f32.gmra.mxu0 %vm158_vm0, %v54_v40  ;;  %3001 = vmatmul.msk.f32.gmra.mxu3 %vm158_vm0, %v149_v8 }
  0xe8   :  { %v3912_v12 = vpop.f32.mrf.mxu3 }
  0xea   :  { %v593_v47 = vpop.f32.mrf.mxu0 }
  0xeb   :  { %v3294_v51 = vpop.eup %3293  ;;  %v594_v52 = vadd.f32 %v3700_v34, %v593_v47 }
  0xec   :  { %3016 = vmatmul.msk.f32.gmra.mxu1 %vm1066_vm1, %v3294_v51 }
  0xed   :  { %3295 = vtanh.f32 %v594_v52  ;;  %2907 = vmatmul.msk.f32.gmra.mxu0 %vm158_vm0, %v55_v48  ;;  %3002 = vmatmul.msk.f32.gmra.mxu3 %vm158_vm0, %v150_v18  ;;  %v62_v52 = vld [vmem:[%s5467_s0 + $0x120] sm:$0xff]  ;;  %v855_v18 = vadd.f32 %v3700_v34, %v3811_v25 }
  0xf0   :  { %v3928_v24 = vpop.f32.mrf.mxu3 }
  0xf2   :  { %v596_v55 = vpop.f32.mrf.mxu0 }
  0xf3   :  { %v3296_v58 = vpop.eup %3295  ;;  %v597_v60 = vadd.f32 %v3700_v34, %v596_v55 }
  0xf4   :  { %3017 = vmatmul.msk.f32.gmra.mxu1 %vm1066_vm1, %v3296_v58 }
  0xf5   :  { %3297 = vtanh.f32 %v597_v60  ;;  %2908 = vmatmul.msk.f32.gmra.mxu0 %vm158_vm0, %v56_v56  ;;  %3003 = vmatmul.msk.f32.gmra.mxu3 %vm158_vm0, %v151_v30  ;;  %v849_v56 = vadd.f32 %v3700_v34, %v3787_v13  ;;  %v858_v30 = vadd.f32 %v3700_v34, %v3823_v31 }
  0xf8   :  { %v3944_v36 = vpop.f32.mrf.mxu3 }
  0xfa   :  { %v599_v62 = vpop.f32.mrf.mxu0 }
  0xfb   :  { %v3298_v2 = vpop.eup %3297  ;;  %v600_v3 = vadd.f32 %v3700_v34, %v599_v62 }
  0xfc   :  { %3018 = vmatmul.msk.f32.gmra.mxu1 %vm1066_vm1, %v3298_v2 }
  0xfd   :  { %3299 = vtanh.f32 %v600_v3  ;;  %2909 = vmatmul.msk.f32.gmra.mxu0 %vm158_vm0, %v57_v63 }
 0x100   :  { %v3957_v47 = vpop.f32.mrf.mxu3 }
 0x102   :  { %v602_v5 = vpop.f32.mrf.mxu0 }
 0x103   :  { %v3300_v9 = vpop.eup %3299  ;;  %v603_v10 = vadd.f32 %v3700_v34, %v602_v5  ;;  %v852_v5 = vadd.f32 %v3700_v34, %v3799_v19 }
 0x104   :  { %3019 = vmatmul.msk.f32.gmra.mxu1 %vm1066_vm1, %v3300_v9 }
 0x105   :  { %3301 = vtanh.f32 %v603_v10  ;;  %2910 = vmatmul.msk.f32.gmra.mxu0 %vm158_vm0, %v58_v6 }
 0x108   :  { %v3970_v57 = vpop.f32.mrf.mxu3 }
 0x109   :  { %v1462_v14 = vpop.f32.mrf.mxu1 }
 0x10a   :  { %v1463_v15 = vadd.f32 %v3910_v11, %v1462_v14  ;;  %v605_v16 = vpop.f32.mrf.mxu0 }
 0x10b   :  { %v3302_v20 = vpop.eup %3301  ;;  %v606_v21 = vadd.f32 %v3700_v34, %v605_v16 }
 0x10c   :  { %v1840_v22 = vmax.f32 %v1463_v15, 0.0  ;;  %3020 = vmatmul.msk.f32.gmra.mxu1 %vm1066_vm1, %v3302_v20  ;;  %v64_v15 = vld [vmem:[%s5467_s0 + $0x130] sm:$0xff] }
 0x10d   :  { %3303 = vtanh.f32 %v606_v21  ;;  %2911 = vmatmul.msk.f32.gmra.mxu0 %vm158_vm0, %v59_v17 }
 0x10e   :  { %3130 = vmatmul.msk.f32.vlgmr.msra.gmra.mxu2 %vm1066_vm1, %v1840_v22  ;;  %3305 = vtanh.f32 %v840_v23 }
 0x110   :  { %v3983_v6 = vpop.f32.mrf.mxu3 }
 0x111   :  { %v1465_v26 = vpop.f32.mrf.mxu1 }
 0x112   :  { %v1466_v27 = vadd.f32 %v3910_v11, %v1465_v26  ;;  %v608_v28 = vpop.f32.mrf.mxu0 }
 0x113   :  { %v3304_v32 = vpop.eup %3303  ;;  %v609_v59 = vadd.f32 %v3700_v34, %v608_v28 }
 0x114   :  { %v1841_v33 = vmax.f32 %v1466_v27, 0.0  ;;  %3021 = vmatmul.msk.f32.gmra.mxu1 %vm1066_vm1, %v3304_v32  ;;  %v3306_v37 = vpop.eup %3305  ;;  %v65_v27 = vld [vmem:[%s5467_s0 + $0x138] sm:$0xff] }
 0x115   :  { %3307 = vtanh.f32 %v609_v59  ;;  %2912 = vmatmul.msk.f32.gmra.mxu0 %vm158_vm0, %v60_v29  ;;  %3099 = vmatmul.msk.f32.vlgmr.msrb.gmra.mxu3 %vm1066_vm1, %v3306_v37 }
 0x116   :  { %3131 = vmatmul.msk.f32.gmra.mxu2 %vm1066_vm1, %v1841_v33  ;;  %3309 = vtanh.f32 %v843_v35 }
 0x118   :  { %v3996_v20 = vpop.f32.mrf.mxu3 }
 0x119   :  { %v1468_v39 = vpop.f32.mrf.mxu1 }
 0x11a   :  { %v1469_v40 = vadd.f32 %v3910_v11, %v1468_v39  ;;  %v611_v41 = vpop.f32.mrf.mxu0  ;;  %v66_v39 = vld [vmem:[%s5467_s0 + $0x140] sm:$0xff] }
 0x11b   :  { %v3308_v43 = vpop.eup %3307  ;;  %v612_v44 = vadd.f32 %v3700_v34, %v611_v41 }
 0x11c   :  { %v1842_v1 = vmax.f32 %v1469_v40, 0.0  ;;  %3022 = vmatmul.msk.f32.gmra.mxu1 %vm1066_vm1, %v3308_v43  ;;  %v3310_v48 = vpop.eup %3309 }
 0x11d   :  { %3311 = vtanh.f32 %v612_v44  ;;  %2913 = vmatmul.msk.f32.gmra.mxu0 %vm158_vm0, %v61_v42  ;;  %3100 = vmatmul.msk.f32.gmra.mxu3 %vm1066_vm1, %v3310_v48  ;;  %v861_v42 = vadd.f32 %v3700_v34, %v3835_v38 }
 0x11e   :  { %3132 = vmatmul.msk.f32.gmra.mxu2 %vm1066_vm1, %v1842_v1  ;;  %3313 = vtanh.f32 %v846_v46 }
 0x120   :  { %v4009_v32 = vpop.f32.mrf.mxu3 }
 0x121   :  { %v1471_v49 = vpop.f32.mrf.mxu1 }
 0x122   :  { %v1472_v50 = vadd.f32 %v3910_v11, %v1471_v49  ;;  %v614_v51 = vpop.f32.mrf.mxu0  ;;  %v67_v49 = vld [vmem:[%s5467_s0 + $0x148] sm:$0xff] }
 0x123   :  { %v3312_v53 = vpop.eup %3311  ;;  %v615_v55 = vadd.f32 %v3700_v34, %v614_v51 }
 0x124   :  { %v1843_v7 = vmax.f32 %v1472_v50, 0.0  ;;  %3023 = vmatmul.msk.f32.gmra.mxu1 %vm1066_vm1, %v3312_v53  ;;  %v3314_v58 = vpop.eup %3313 }
 0x125   :  { %3315 = vtanh.f32 %v615_v55  ;;  %2914 = vmatmul.msk.f32.gmra.mxu0 %vm158_vm0, %v62_v52  ;;  %3101 = vmatmul.msk.f32.gmra.mxu3 %vm1066_vm1, %v3314_v58  ;;  %v864_v52 = vadd.f32 %v3700_v34, %v3850_v45 }
 0x126   :  { %3133 = vmatmul.msk.f32.gmra.mxu2 %vm1066_vm1, %v1843_v7  ;;  %3317 = vtanh.f32 %v849_v56 }
 0x128   :  { %v4022_v43 = vpop.f32.mrf.mxu3 }
 0x129   :  { %v1474_v60 = vpop.f32.mrf.mxu1 }
 0x12a   :  { %v1475_v62 = vadd.f32 %v3910_v11, %v1474_v60  ;;  %v617_v63 = vpop.f32.mrf.mxu0  ;;  %v68_v60 = vld [vmem:[%s5467_s0 + $0x150] sm:$0xff] }
 0x12b   :  { %v3316_v2 = vpop.eup %3315  ;;  %v618_v3 = vadd.f32 %v3700_v34, %v617_v63 }
 0x12c   :  { %v1844_v13 = vmax.f32 %v1475_v62, 0.0  ;;  %3024 = vmatmul.msk.f32.gmra.mxu1 %vm1066_vm1, %v3316_v2  ;;  %v3318_v8 = vpop.eup %3317 }
 0x12d   :  { %3319 = vtanh.f32 %v618_v3  ;;  %2915 = vmatmul.msk.f32.gmra.mxu0 %vm158_vm0, %v63_v0  ;;  %3102 = vmatmul.msk.f32.gmra.mxu3 %vm1066_vm1, %v3318_v8  ;;  %v867_v0 = vadd.f32 %v3700_v34, %v3871_v54 }
 0x12e   :  { %3134 = vmatmul.msk.f32.gmra.mxu2 %vm1066_vm1, %v1844_v13  ;;  %3321 = vtanh.f32 %v852_v5 }
 0x130   :  { %v4035_v53 = vpop.f32.mrf.mxu3 }
 0x131   :  { %v1477_v9 = vpop.f32.mrf.mxu1 }
 0x132   :  { %v1478_v10 = vadd.f32 %v3910_v11, %v1477_v9  ;;  %v620_v14 = vpop.f32.mrf.mxu0  ;;  %v69_v9 = vld [vmem:[%s5467_s0 + $0x158] sm:$0xff] }
 0x133   :  { %v3320_v16 = vpop.eup %3319  ;;  %v621_v17 = vadd.f32 %v3700_v34, %v620_v14 }
 0x134   :  { %v1845_v19 = vmax.f32 %v1478_v10, 0.0  ;;  %3025 = vmatmul.msk.f32.gmra.mxu1 %vm1066_vm1, %v3320_v16  ;;  %v3322_v21 = vpop.eup %3321 }
 0x135   :  { %3323 = vtanh.f32 %v621_v17  ;;  %2916 = vmatmul.msk.f32.gmra.mxu0 %vm158_vm0, %v64_v15  ;;  %3103 = vmatmul.msk.f32.gmra.mxu3 %vm1066_vm1, %v3322_v21  ;;  %v870_v15 = vadd.f32 %v3700_v34, %v3883_v61 }
 0x136   :  { %3135 = vmatmul.msk.f32.gmra.mxu2 %vm1066_vm1, %v1845_v19  ;;  %3325 = vtanh.f32 %v855_v18 }
 0x138   :  { %v4048_v2 = vpop.f32.mrf.mxu3 }
 0x139   :  { %v1480_v22 = vpop.f32.mrf.mxu1 }
 0x13a   :  { %v1481_v23 = vadd.f32 %v3910_v11, %v1480_v22  ;;  %v623_v26 = vpop.f32.mrf.mxu0  ;;  %v70_v22 = vld [vmem:[%s5467_s0 + $0x160] sm:$0xff] }
 0x13b   :  { %v3324_v28 = vpop.eup %3323  ;;  %v624_v29 = vadd.f32 %v3700_v34, %v623_v26 }
 0x13c   :  { %v1846_v25 = vmax.f32 %v1481_v23, 0.0  ;;  %3026 = vmatmul.msk.f32.gmra.mxu1 %vm1066_vm1, %v3324_v28  ;;  %v3326_v59 = vpop.eup %3325 }
 0x13d   :  { %3327 = vtanh.f32 %v624_v29  ;;  %2917 = vmatmul.msk.f32.gmra.mxu0 %vm158_vm0, %v65_v27  ;;  %3104 = vmatmul.msk.f32.gmra.mxu3 %vm1066_vm1, %v3326_v59  ;;  %v873_v27 = vadd.f32 %v3700_v34, %v3895_v4 }
 0x13e   :  { %3136 = vmatmul.msk.f32.gmra.mxu2 %vm1066_vm1, %v1846_v25  ;;  %3329 = vtanh.f32 %v858_v30 }
 0x140   :  { %v4061_v16 = vpop.f32.mrf.mxu3 }
 0x141   :  { %v1483_v33 = vpop.f32.mrf.mxu1 }
 0x142   :  { %v1484_v35 = vadd.f32 %v3910_v11, %v1483_v33  ;;  %v626_v37 = vpop.f32.mrf.mxu0  ;;  %v71_v33 = vld [vmem:[%s5467_s0 + $0x168] sm:$0xff] }
 0x143   :  { %v3328_v40 = vpop.eup %3327  ;;  %v627_v41 = vadd.f32 %v3700_v34, %v626_v37 }
 0x144   :  { %v1847_v31 = vmax.f32 %v1484_v35, 0.0  ;;  %3027 = vmatmul.msk.f32.gmra.mxu1 %vm1066_vm1, %v3328_v40  ;;  %v3330_v44 = vpop.eup %3329 }
 0x145   :  { %3331 = vtanh.f32 %v627_v41  ;;  %2918 = vmatmul.msk.f32.gmra.mxu0 %vm158_vm0, %v66_v39  ;;  %3105 = vmatmul.msk.f32.gmra.mxu3 %vm1066_vm1, %v3330_v44  ;;  %v876_v39 = vadd.f32 %v3700_v34, %v3912_v12 }
 0x146   :  { %3137 = vmatmul.msk.f32.gmra.mxu2 %vm1066_vm1, %v1847_v31  ;;  %3333 = vtanh.f32 %v861_v42 }
 0x148   :  { %v4074_v28 = vpop.f32.mrf.mxu3 }
 0x149   :  { %v1486_v1 = vpop.f32.mrf.mxu1 }
 0x14a   :  { %v1487_v46 = vadd.f32 %v3910_v11, %v1486_v1  ;;  %v629_v48 = vpop.f32.mrf.mxu0  ;;  %v72_v1 = vld [vmem:[%s5467_s0 + $0x170] sm:$0xff] }
 0x14b   :  { %v3332_v50 = vpop.eup %3331  ;;  %v630_v51 = vadd.f32 %v3700_v34, %v629_v48 }
 0x14c   :  { %v1848_v38 = vmax.f32 %v1487_v46, 0.0  ;;  %3028 = vmatmul.msk.f32.gmra.mxu1 %vm1066_vm1, %v3332_v50  ;;  %v3334_v55 = vpop.eup %3333 }
 0x14d   :  { %3335 = vtanh.f32 %v630_v51  ;;  %2919 = vmatmul.msk.f32.gmra.mxu0 %vm158_vm0, %v67_v49  ;;  %3106 = vmatmul.msk.f32.gmra.mxu3 %vm1066_vm1, %v3334_v55  ;;  %v879_v49 = vadd.f32 %v3700_v34, %v3928_v24 }
 0x14e   :  { %3138 = vmatmul.msk.f32.gmra.mxu2 %vm1066_vm1, %v1848_v38  ;;  %3337 = vtanh.f32 %v864_v52 }
 0x150   :  { %v4087_v40 = vpop.f32.mrf.mxu3 }
 0x151   :  { %v1489_v7 = vpop.f32.mrf.mxu1 }
 0x152   :  { %v1490_v56 = vadd.f32 %v3910_v11, %v1489_v7  ;;  %v632_v58 = vpop.f32.mrf.mxu0  ;;  %v73_v7 = vld [vmem:[%s5467_s0 + $0x178] sm:$0xff] }
 0x153   :  { %v3336_v62 = vpop.eup %3335  ;;  %v633_v63 = vadd.f32 %v3700_v34, %v632_v58 }
 0x154   :  { %v1849_v45 = vmax.f32 %v1490_v56, 0.0  ;;  %3029 = vmatmul.msk.f32.gmra.mxu1 %vm1066_vm1, %v3336_v62  ;;  %v3338_v3 = vpop.eup %3337 }
 0x155   :  { %3339 = vtanh.f32 %v633_v63  ;;  %2920 = vmatmul.msk.f32.gmra.mxu0 %vm158_vm0, %v68_v60  ;;  %3107 = vmatmul.msk.f32.gmra.mxu3 %vm1066_vm1, %v3338_v3  ;;  %v882_v60 = vadd.f32 %v3700_v34, %v3944_v36 }
 0x156   :  { %3139 = vmatmul.msk.f32.gmra.mxu2 %vm1066_vm1, %v1849_v45  ;;  %3341 = vtanh.f32 %v867_v0 }
 0x158   :  { %v4100_v50 = vpop.f32.mrf.mxu3 }
 0x159   :  { %v1492_v13 = vpop.f32.mrf.mxu1 }
 0x15a   :  { %v1493_v5 = vadd.f32 %v3910_v11, %v1492_v13  ;;  %v635_v8 = vpop.f32.mrf.mxu0  ;;  %v74_v13 = vld [vmem:[%s5467_s0 + $0x180] sm:$0xff] }
 0x15b   :  { %v3340_v10 = vpop.eup %3339  ;;  %v636_v14 = vadd.f32 %v3700_v34, %v635_v8 }
 0x15c   :  { %v1850_v54 = vmax.f32 %v1493_v5, 0.0  ;;  %3030 = vmatmul.msk.f32.gmra.mxu1 %vm1066_vm1, %v3340_v10  ;;  %v3342_v17 = vpop.eup %3341 }
 0x15d   :  { %3343 = vtanh.f32 %v636_v14  ;;  %2921 = vmatmul.msk.f32.gmra.mxu0 %vm158_vm0, %v69_v9  ;;  %3108 = vmatmul.msk.f32.gmra.mxu3 %vm1066_vm1, %v3342_v17  ;;  %v885_v9 = vadd.f32 %v3700_v34, %v3957_v47 }
 0x15e   :  { %3140 = vmatmul.msk.f32.gmra.mxu2 %vm1066_vm1, %v1850_v54  ;;  %3345 = vtanh.f32 %v870_v15 }
 0x160   :  { %v4113_v62 = vpop.f32.mrf.mxu3 }
 0x161   :  { %v1495_v19 = vpop.f32.mrf.mxu1 }
 0x162   :  { %v1496_v18 = vadd.f32 %v3910_v11, %v1495_v19  ;;  %v638_v21 = vpop.f32.mrf.mxu0  ;;  %v75_v19 = vld [vmem:[%s5467_s0 + $0x188] sm:$0xff] }
 0x163   :  { %v3344_v23 = vpop.eup %3343  ;;  %v639_v26 = vadd.f32 %v3700_v34, %v638_v21 }
 0x164   :  { %v1851_v61 = vmax.f32 %v1496_v18, 0.0  ;;  %3031 = vmatmul.msk.f32.gmra.mxu1 %vm1066_vm1, %v3344_v23  ;;  %v3346_v29 = vpop.eup %3345  ;;  %v4142_v23 = vld [vmem:[%s5472_s6] ss:$0 sm:$0xff] }
 0x165   :  { %3347 = vtanh.f32 %v639_v26  ;;  %2922 = vmatmul.msk.f32.gmra.mxu0 %vm158_vm0, %v70_v22  ;;  %3109 = vmatmul.msk.f32.gmra.mxu3 %vm1066_vm1, %v3346_v29  ;;  %v888_v22 = vadd.f32 %v3700_v34, %v3970_v57  ;;  %v76_v57 = vld [vmem:[%s5467_s0 + $0x190] sm:$0xff] }
 0x166   :  { %3141 = vmatmul.msk.f32.gmra.mxu2 %vm1066_vm1, %v1851_v61  ;;  %3349 = vtanh.f32 %v873_v27 }
 0x168   :  { %v4126_v10 = vpop.f32.mrf.mxu3 }
 0x169   :  { %v1498_v25 = vpop.f32.mrf.mxu1 }
 0x16a   :  { %v1499_v30 = vadd.f32 %v3910_v11, %v1498_v25  ;;  %v641_v59 = vpop.f32.mrf.mxu0 }
 0x16b   :  { %v3348_v35 = vpop.eup %3347  ;;  %v642_v37 = vadd.f32 %v3700_v34, %v641_v59 }
 0x16c   :  { %v1852_v4 = vmax.f32 %v1499_v30, 0.0  ;;  %3032 = vmatmul.msk.f32.gmra.mxu1 %vm1066_vm1, %v3348_v35  ;;  %v3350_v41 = vpop.eup %3349 }
 0x16d   :  { %3351 = vtanh.f32 %v642_v37  ;;  %2923 = vmatmul.msk.f32.gmra.mxu0 %vm158_vm0, %v71_v33  ;;  %3110 = vmatmul.msk.f32.gmra.mxu3 %vm1066_vm1, %v3350_v41 }
 0x16e   :  { %3142 = vmatmul.msk.f32.gmra.mxu2 %vm1066_vm1, %v1852_v4  ;;  %3353 = vtanh.f32 %v876_v39  ;;  %v891_v4 = vadd.f32 %v3700_v34, %v3983_v6 }
 0x170   :  { %v4144_v26 = vpop.f32.mrf.mxu3 }
 0x171   :  { %v1501_v31 = vpop.f32.mrf.mxu1 }
 0x172   :  { %v1502_v42 = vadd.f32 %v3910_v11, %v1501_v31  ;;  %v644_v44 = vpop.f32.mrf.mxu0 }
 0x173   :  { %v3352_v46 = vpop.eup %3351  ;;  %v645_v48 = vadd.f32 %v3700_v34, %v644_v44 }
 0x174   :  { %v1853_v12 = vmax.f32 %v1502_v42, 0.0  ;;  %3033 = vmatmul.msk.f32.gmra.mxu1 %vm1066_vm1, %v3352_v46  ;;  %v3354_v51 = vpop.eup %3353 }
 0x175   :  { %3355 = vtanh.f32 %v645_v48  ;;  %2924 = vmatmul.msk.f32.gmra.mxu0 %vm158_vm0, %v72_v1  ;;  %3111 = vmatmul.msk.f32.gmra.mxu3 %vm1066_vm1, %v3354_v51  ;;  %v77_v48 = vld [vmem:[%s5467_s0 + $0x198] sm:$0xff]  ;;  %v894_v51 = vadd.f32 %v3700_v34, %v3996_v20 }
 0x176   :  { %3143 = vmatmul.msk.f32.gmra.mxu2 %vm1066_vm1, %v1853_v12  ;;  %3357 = vtanh.f32 %v879_v49 }
 0x178   :  { %v4162_v39 = vpop.f32.mrf.mxu3 }
 0x179   :  { %v1504_v38 = vpop.f32.mrf.mxu1 }
 0x17a   :  { %v1505_v52 = vadd.f32 %v3910_v11, %v1504_v38  ;;  %v647_v55 = vpop.f32.mrf.mxu0 }
 0x17b   :  { %v3356_v56 = vpop.eup %3355  ;;  %v648_v58 = vadd.f32 %v3700_v34, %v647_v55 }
 0x17c   :  { %v1854_v24 = vmax.f32 %v1505_v52, 0.0  ;;  %3034 = vmatmul.msk.f32.gmra.mxu1 %vm1066_vm1, %v3356_v56  ;;  %v3358_v63 = vpop.eup %3357 }
 0x17d   :  { %3359 = vtanh.f32 %v648_v58  ;;  %2925 = vmatmul.msk.f32.gmra.mxu0 %vm158_vm0, %v73_v7  ;;  %3112 = vmatmul.msk.f32.gmra.mxu3 %vm1066_vm1, %v3358_v63 }
 0x17e   :  { %3144 = vmatmul.msk.f32.gmra.mxu2 %vm1066_vm1, %v1854_v24  ;;  %3361 = vtanh.f32 %v882_v60  ;;  %v78_v60 = vld [vmem:[%s5467_s0 + $0x1a0] sm:$0xff] }
 0x181   :  { %v1507_v45 = vpop.f32.mrf.mxu1 }
 0x182   :  { %v1508_v0 = vadd.f32 %v3910_v11, %v1507_v45  ;;  %v650_v3 = vpop.f32.mrf.mxu0 }
 0x183   :  { %v3360_v5 = vpop.eup %3359  ;;  %v651_v8 = vadd.f32 %v3700_v34, %v650_v3 }
 0x184   :  { %v1855_v36 = vmax.f32 %v1508_v0, 0.0  ;;  %3035 = vmatmul.msk.f32.gmra.mxu1 %vm1066_vm1, %v3360_v5  ;;  %v3362_v14 = vpop.eup %3361  ;;  %v4198_v0 = vld [vmem:[%s5468_s2] ss:$0 sm:$0xff] }
 0x185   :  { %3363 = vtanh.f32 %v651_v8  ;;  %2926 = vmatmul.msk.f32.gmra.mxu0 %vm158_vm0, %v74_v13  ;;  %3113 = vmatmul.msk.f32.gmra.mxu3 %vm1066_vm1, %v3362_v14 }
 0x186   :  { %3145 = vmatmul.msk.f32.gmra.mxu2 %vm1066_vm1, %v1855_v36  ;;  %3365 = vtanh.f32 %v885_v9 }
 0x189   :  { %v1510_v54 = vpop.f32.mrf.mxu1 }
 0x18a   :  { %v1511_v15 = vadd.f32 %v3910_v11, %v1510_v54  ;;  %v653_v17 = vpop.f32.mrf.mxu0  ;;  %v79_v54 = vld [vmem:[%s5467_s0 + $0x1a8] sm:$0xff] }
 0x18b   :  { %v3364_v18 = vpop.eup %3363  ;;  %v654_v21 = vadd.f32 %v3700_v34, %v653_v17 }
 0x18c   :  { %v1856_v47 = vmax.f32 %v1511_v15, 0.0  ;;  %3036 = vmatmul.msk.f32.gmra.mxu1 %vm1066_vm1, %v3364_v18  ;;  %v3366_v61 = vpop.eup %3365 }
 0x18d   :  { %3367 = vtanh.f32 %v654_v21  ;;  %2927 = vmatmul.msk.f32.gmra.mxu0 %vm158_vm0, %v75_v19  ;;  %3114 = vmatmul.msk.f32.gmra.mxu3 %vm1066_vm1, %v3366_v61  ;;  %v900_v19 = vadd.f32 %v4198_v0, %v4022_v43 }
 0x18e   :  { %3146 = vmatmul.msk.f32.gmra.mxu2 %vm1066_vm1, %v1856_v47  ;;  %3369 = vtanh.f32 %v888_v22 }
 0x191   :  { %v1513_v27 = vpop.f32.mrf.mxu1  ;;  %v2369_v29 = vpop.f32.mrf.mxu2 }
 0x192   :  { %v1514_v25 = vadd.f32 %v3910_v11, %v1513_v27  ;;  %v2370_v30 = vadd.f32 %v4142_v23, %v2369_v29  ;;  %v656_v59 = vpop.f32.mrf.mxu0 }
 0x193   :  { %v3368_v33 = vpop.eup %3367  ;;  %v657_v35 = vadd.f32 %v3700_v34, %v656_v59 }
 0x194   :  { %v1857_v37 = vmax.f32 %v1514_v25, 0.0  ;;  %2748 = vst.msk [vmem:[%s5473_s7] sm:$0xff] %vm2747_vm2, %v2370_v30  ;;  %3037 = vmatmul.msk.f32.gmra.mxu1 %vm1066_vm1, %v3368_v33  ;;  %v3370_v41 = vpop.eup %3369  ;;  %v80_v25 = vld [vmem:[%s5467_s0 + $0x1b0] sm:$0xff] }
 0x195   :  { %3371 = vtanh.f32 %v657_v35  ;;  %2928 = vmatmul.msk.f32.gmra.mxu0 %vm158_vm0, %v76_v57  ;;  %3115 = vmatmul.msk.f32.gmra.mxu3 %vm1066_vm1, %v3370_v41  ;;  %v903_v57 = vadd.f32 %v4198_v0, %v4035_v53 }
 0x196   :  { %3147 = vmatmul.msk.f32.gmra.mxu2 %vm1066_vm1, %v1857_v37  ;;  %3373 = vtanh.f32 %v891_v4 }
 0x198   :  { %v4180_v38 = vpop.f32.mrf.mxu3 }
 0x199   :  { %v1516_v31 = vpop.f32.mrf.mxu1  ;;  %v2372_v42 = vpop.f32.mrf.mxu2 }
 0x19a   :  { %v1517_v44 = vadd.f32 %v3910_v11, %v1516_v31  ;;  %v2373_v1 = vadd.f32 %v4142_v23, %v2372_v42  ;;  %v659_v46 = vpop.f32.mrf.mxu0 }
 0x19b   :  { %v3372_v12 = vpop.eup %3371  ;;  %v660_v6 = vadd.f32 %v3700_v34, %v659_v46 }
 0x19c   :  { %v1858_v49 = vmax.f32 %v1517_v44, 0.0  ;;  %2749 = vst.msk [vmem:[%s5473_s7 + $0x8] sm:$0xff] %vm2747_vm2, %v2373_v1  ;;  %3038 = vmatmul.msk.f32.gmra.mxu1 %vm1066_vm1, %v3372_v12  ;;  %v3374_v52 = vpop.eup %3373  ;;  %v81_v44 = vld [vmem:[%s5467_s0 + $0x1b8] sm:$0xff] }
 0x19d   :  { %3375 = vtanh.f32 %v660_v6  ;;  %2929 = vmatmul.msk.f32.gmra.mxu0 %vm158_vm0, %v77_v48  ;;  %3116 = vmatmul.msk.f32.gmra.mxu3 %vm1066_vm1, %v3374_v52  ;;  %v906_v48 = vadd.f32 %v4198_v0, %v4048_v2 }
 0x19e   :  { %3148 = vmatmul.msk.f32.gmra.mxu2 %vm1066_vm1, %v1858_v49  ;;  %3377 = vtanh.f32 %v894_v51 }
 0x1a0   :  { %v4203_v3 = vpop.f32.mrf.mxu3 }
 0x1a1   :  { %v1519_v55 = vpop.f32.mrf.mxu1  ;;  %v2375_v7 = vpop.f32.mrf.mxu2 }
 0x1a2   :  { %v1520_v56 = vadd.f32 %v3910_v11, %v1519_v55  ;;  %v2376_v58 = vadd.f32 %v4142_v23, %v2375_v7  ;;  %v662_v24 = vpop.f32.mrf.mxu0 }
 0x1a3   :  { %v3376_v63 = vpop.eup %3375  ;;  %v663_v20 = vadd.f32 %v3700_v34, %v662_v24  ;;  %v897_v34 = vadd.f32 %v4198_v0, %v4009_v32 }
 0x1a4   :  { %v1859_v45 = vmax.f32 %v1520_v56, 0.0  ;;  %2750 = vst.msk [vmem:[%s5473_s7 + $0x10] sm:$0xff] %vm2747_vm2, %v2376_v58  ;;  %3039 = vmatmul.msk.f32.gmra.mxu1 %vm1066_vm1, %v3376_v63  ;;  %v3378_v13 = vpop.eup %3377  ;;  %v82_v56 = vld [vmem:[%s5467_s0 + $0x1c0] sm:$0xff] }
 0x1a5   :  { %3379 = vtanh.f32 %v663_v20  ;;  %2930 = vmatmul.msk.f32.gmra.mxu0 %vm158_vm0, %v78_v60  ;;  %3117 = vmatmul.msk.f32.gmra.mxu3 %vm1066_vm1, %v3378_v13  ;;  %v909_v60 = vadd.f32 %v4198_v0, %v4061_v16 }
 0x1a6   :  { %3149 = vmatmul.msk.f32.gmra.mxu2 %vm1066_vm1, %v1859_v45  ;;  %3381 = vtanh.f32 %v897_v34 }
 0x1a8   :  { %v4221_v18 = vpop.f32.mrf.mxu3 }
 0x1a9   :  { %v1522_v5 = vpop.f32.mrf.mxu1  ;;  %v2378_v8 = vpop.f32.mrf.mxu2 }
 0x1aa   :  { %v1523_v36 = vadd.f32 %v3910_v11, %v1522_v5  ;;  %v2379_v9 = vadd.f32 %v4142_v23, %v2378_v8  ;;  %v665_v14 = vpop.f32.mrf.mxu0 }
 0x1ab   :  { %v3380_v15 = vpop.eup %3379  ;;  %v666_v32 = vadd.f32 %v4198_v0, %v665_v14 }
 0x1ac   :  { %v1860_v17 = vmax.f32 %v1523_v36, 0.0  ;;  %2751 = vst.msk [vmem:[%s5473_s7 + $0x18] sm:$0xff] %vm2747_vm2, %v2379_v9  ;;  %3040 = vmatmul.msk.f32.gmra.mxu1 %vm1066_vm1, %v3380_v15  ;;  %v3382_v21 = vpop.eup %3381  ;;  %v83_v36 = vld [vmem:[%s5467_s0 + $0x1c8] sm:$0xff] }
 0x1ad   :  { %3383 = vtanh.f32 %v666_v32  ;;  %2931 = vmatmul.msk.f32.gmra.mxu0 %vm158_vm0, %v79_v54  ;;  %3118 = vmatmul.msk.f32.gmra.mxu3 %vm1066_vm1, %v3382_v21  ;;  %v912_v54 = vadd.f32 %v4198_v0, %v4074_v28 }
 0x1ae   :  { %3150 = vmatmul.msk.f32.gmra.mxu2 %vm1066_vm1, %v1860_v17  ;;  %3385 = vtanh.f32 %v900_v19 }
 0x1b0   :  { %v4239_v33 = vpop.f32.mrf.mxu3 }
 0x1b1   :  { %v1525_v47 = vpop.f32.mrf.mxu1  ;;  %v2381_v22 = vpop.f32.mrf.mxu2 }
 0x1b2   :  { %v1526_v61 = vadd.f32 %v3910_v11, %v1525_v47  ;;  %v2382_v27 = vadd.f32 %v4142_v23, %v2381_v22  ;;  %v668_v29 = vpop.f32.mrf.mxu0 }
 0x1b3   :  { %v3384_v30 = vpop.eup %3383  ;;  %v669_v43 = vadd.f32 %v4198_v0, %v668_v29 }
 0x1b4   :  { %v1861_v59 = vmax.f32 %v1526_v61, 0.0  ;;  %2752 = vst.msk [vmem:[%s5473_s7 + $0x20] sm:$0xff] %vm2747_vm2, %v2382_v27  ;;  %3041 = vmatmul.msk.f32.gmra.mxu1 %vm1066_vm1, %v3384_v30  ;;  %v3386_v35 = vpop.eup %3385  ;;  %v84_v61 = vld [vmem:[%s5467_s0 + $0x1d0] sm:$0xff] }
 0x1b5   :  { %3387 = vtanh.f32 %v669_v43  ;;  %2932 = vmatmul.msk.f32.gmra.mxu0 %vm158_vm0, %v80_v25  ;;  %3119 = vmatmul.msk.f32.gmra.mxu3 %vm1066_vm1, %v3386_v35  ;;  %v915_v25 = vadd.f32 %v4198_v0, %v4087_v40 }
 0x1b6   :  { %3151 = vmatmul.msk.f32.gmra.mxu2 %vm1066_vm1, %v1861_v59  ;;  %3389 = vtanh.f32 %v903_v57 }
 0x1b8   :  { %v4257_v12 = vpop.f32.mrf.mxu3 }
 0x1b9   :  { %v1528_v37 = vpop.f32.mrf.mxu1  ;;  %v2384_v4 = vpop.f32.mrf.mxu2 }
 0x1ba   :  { %v1529_v41 = vadd.f32 %v3910_v11, %v1528_v37  ;;  %v2385_v31 = vadd.f32 %v4142_v23, %v2384_v4  ;;  %v671_v42 = vpop.f32.mrf.mxu0 }
 0x1bb   :  { %v3388_v1 = vpop.eup %3387  ;;  %v672_v53 = vadd.f32 %v4198_v0, %v671_v42 }
 0x1bc   :  { %v1862_v46 = vmax.f32 %v1529_v41, 0.0  ;;  %2753 = vst.msk [vmem:[%s5473_s7 + $0x28] sm:$0xff] %vm2747_vm2, %v2385_v31  ;;  %3042 = vmatmul.msk.f32.gmra.mxu1 %vm1066_vm1, %v3388_v1  ;;  %v3390_v6 = vpop.eup %3389  ;;  %v85_v41 = vld [vmem:[%s5467_s0 + $0x1d8] sm:$0xff] }
 0x1bd   :  { %3391 = vtanh.f32 %v672_v53  ;;  %2933 = vmatmul.msk.f32.gmra.mxu0 %vm158_vm0, %v81_v44  ;;  %3120 = vmatmul.msk.f32.gmra.mxu3 %vm1066_vm1, %v3390_v6  ;;  %v918_v44 = vadd.f32 %v4198_v0, %v4100_v50 }
 0x1be   :  { %3152 = vmatmul.msk.f32.gmra.mxu2 %vm1066_vm1, %v1862_v46  ;;  %3393 = vtanh.f32 %v906_v48 }
 0x1c0   :  { %v4275_v63 = vpop.f32.mrf.mxu3 }
 0x1c1   :  { %v1531_v49 = vpop.f32.mrf.mxu1  ;;  %v2387_v51 = vpop.f32.mrf.mxu2 }
 0x1c2   :  { %v1532_v52 = vadd.f32 %v3910_v11, %v1531_v49  ;;  %v2388_v55 = vadd.f32 %v4142_v23, %v2387_v51  ;;  %v674_v7 = vpop.f32.mrf.mxu0 }
 0x1c3   :  { %v3392_v58 = vpop.eup %3391  ;;  %v675_v2 = vadd.f32 %v4198_v0, %v674_v7 }
 0x1c4   :  { %v1863_v24 = vmax.f32 %v1532_v52, 0.0  ;;  %2754 = vst.msk [vmem:[%s5473_s7 + $0x30] sm:$0xff] %vm2747_vm2, %v2388_v55  ;;  %3043 = vmatmul.msk.f32.gmra.mxu1 %vm1066_vm1, %v3392_v58  ;;  %v3394_v20 = vpop.eup %3393  ;;  %v86_v52 = vld [vmem:[%s5467_s0 + $0x1e0] sm:$0xff] }
 0x1c5   :  { %3395 = vtanh.f32 %v675_v2  ;;  %2934 = vmatmul.msk.f32.gmra.mxu0 %vm158_vm0, %v82_v56  ;;  %3121 = vmatmul.msk.f32.gmra.mxu3 %vm1066_vm1, %v3394_v20  ;;  %v921_v56 = vadd.f32 %v4198_v0, %v4113_v62 }
 0x1c6   :  { %3153 = vmatmul.msk.f32.gmra.mxu2 %vm1066_vm1, %v1863_v24  ;;  %3397 = vtanh.f32 %v909_v60 }
 0x1c8   :  { %v4293_v15 = vpop.f32.mrf.mxu3 }
 0x1c9   :  { %v1534_v45 = vpop.f32.mrf.mxu1  ;;  %v2390_v34 = vpop.f32.mrf.mxu2 }
 0x1ca   :  { %v1535_v13 = vadd.f32 %v3910_v11, %v1534_v45  ;;  %v2391_v5 = vadd.f32 %v4142_v23, %v2390_v34  ;;  %v677_v8 = vpop.f32.mrf.mxu0 }
 0x1cb   :  { %v3396_v9 = vpop.eup %3395  ;;  %v678_v16 = vadd.f32 %v4198_v0, %v677_v8 }
 0x1cc   :  { %v1864_v14 = vmax.f32 %v1535_v13, 0.0  ;;  %2755 = vst.msk [vmem:[%s5473_s7 + $0x38] sm:$0xff] %vm2747_vm2, %v2391_v5  ;;  %3044 = vmatmul.msk.f32.gmra.mxu1 %vm1066_vm1, %v3396_v9  ;;  %v3398_v32 = vpop.eup %3397  ;;  %v87_v13 = vld [vmem:[%s5467_s0 + $0x1e8] sm:$0xff] }
 0x1cd   :  { %3399 = vtanh.f32 %v678_v16  ;;  %2935 = vmatmul.msk.f32.gmra.mxu0 %vm158_vm0, %v83_v36  ;;  %3122 = vmatmul.msk.f32.gmra.mxu3 %vm1066_vm1, %v3398_v32  ;;  %v924_v36 = vadd.f32 %v4198_v0, %v4126_v10 }
 0x1ce   :  { %3154 = vmatmul.msk.f32.gmra.mxu2 %vm1066_vm1, %v1864_v14  ;;  %3401 = vtanh.f32 %v912_v54 }
 0x1d0   :  { %v4311_v30 = vpop.f32.mrf.mxu3 }
 0x1d1   :  { %v1537_v17 = vpop.f32.mrf.mxu1  ;;  %v2393_v19 = vpop.f32.mrf.mxu2 }
 0x1d2   :  { %v1538_v21 = vadd.f32 %v3910_v11, %v1537_v17  ;;  %v2394_v47 = vadd.f32 %v4142_v23, %v2393_v19  ;;  %v680_v22 = vpop.f32.mrf.mxu0 }
 0x1d3   :  { %v3400_v27 = vpop.eup %3399  ;;  %v681_v28 = vadd.f32 %v4198_v0, %v680_v22 }
 0x1d4   :  { %v1865_v29 = vmax.f32 %v1538_v21, 0.0  ;;  %2756 = vst.msk [vmem:[%s5473_s7 + $0x40] sm:$0xff] %vm2747_vm2, %v2394_v47  ;;  %3045 = vmatmul.msk.f32.gmra.mxu1 %vm1066_vm1, %v3400_v27  ;;  %v3402_v43 = vpop.eup %3401  ;;  %v88_v21 = vld [vmem:[%s5467_s0 + $0x1f0] sm:$0xff] }
 0x1d5   :  { %3403 = vtanh.f32 %v681_v28  ;;  %2936 = vmatmul.msk.f32.gmra.mxu0 %vm158_vm0, %v84_v61  ;;  %3123 = vmatmul.msk.f32.gmra.mxu3 %vm1066_vm1, %v3402_v43 }
 0x1d6   :  { %3155 = vmatmul.msk.f32.gmra.mxu2 %vm1066_vm1, %v1865_v29  ;;  %3405 = vtanh.f32 %v915_v25  ;;  %v4388_v25 = vld [vmem:[%s5470_s4] ss:$0 sm:$0xff] }
 0x1d8   :  { %v4329_v1 = vpop.f32.mrf.mxu3 }
 0x1d9   :  { %v1540_v59 = vpop.f32.mrf.mxu1  ;;  %v2396_v57 = vpop.f32.mrf.mxu2 }
 0x1da   :  { %v1541_v35 = vadd.f32 %v3910_v11, %v1540_v59  ;;  %v2397_v37 = vadd.f32 %v4142_v23, %v2396_v57  ;;  %v683_v4 = vpop.f32.mrf.mxu0 }
 0x1db   :  { %v3404_v31 = vpop.eup %3403  ;;  %v684_v40 = vadd.f32 %v4198_v0, %v683_v4 }
 0x1dc   :  { %v1866_v42 = vmax.f32 %v1541_v35, 0.0  ;;  %2757 = vst.msk [vmem:[%s5473_s7 + $0x48] sm:$0xff] %vm2747_vm2, %v2397_v37  ;;  %3046 = vmatmul.msk.f32.gmra.mxu1 %vm1066_vm1, %v3404_v31  ;;  %v3406_v53 = vpop.eup %3405 }
 0x1dd   :  { %3407 = vtanh.f32 %v684_v40  ;;  %2937 = vmatmul.msk.f32.gmra.mxu0 %vm158_vm0, %v85_v41  ;;  %3124 = vmatmul.msk.f32.gmra.mxu3 %vm1066_vm1, %v3406_v53  ;;  %v930_v41 = vadd.f32 %v4198_v0, %v4162_v39 }
 0x1de   :  { %3156 = vmatmul.msk.f32.gmra.mxu2 %vm1066_vm1, %v1866_v42  ;;  %3409 = vtanh.f32 %v918_v44 }
 0x1e0   :  { %v4347_v58 = vpop.f32.mrf.mxu3 }
 0x1e1   :  { %v1543_v46 = vpop.f32.mrf.mxu1  ;;  %v2399_v48 = vpop.f32.mrf.mxu2 }
 0x1e2   :  { %v1544_v6 = vadd.f32 %v3910_v11, %v1543_v46  ;;  %v2400_v49 = vadd.f32 %v4142_v23, %v2399_v48  ;;  %v686_v51 = vpop.f32.mrf.mxu0 }
 0x1e3   :  { %v3408_v55 = vpop.eup %3407  ;;  %v687_v50 = vadd.f32 %v4198_v0, %v686_v51 }
 0x1e4   :  { %v1867_v7 = vmax.f32 %v1544_v6, 0.0  ;;  %2758 = vst.msk [vmem:[%s5473_s7 + $0x50] sm:$0xff] %vm2747_vm2, %v2400_v49  ;;  %3047 = vmatmul.msk.f32.gmra.mxu1 %vm1066_vm1, %v3408_v55  ;;  %v3410_v2 = vpop.eup %3409  ;;  %v90_v6 = vld [vmem:[%s5467_s0 + $0x200] sm:$0xff] }
 0x1e5   :  { %3411 = vtanh.f32 %v687_v50  ;;  %2938 = vmatmul.msk.f32.gmra.mxu0 %vm158_vm0, %v86_v52  ;;  %3125 = vmatmul.msk.f32.gmra.mxu3 %vm1066_vm1, %v3410_v2 }
 0x1e6   :  { %3157 = vmatmul.msk.f32.gmra.mxu2 %vm1066_vm1, %v1867_v7  ;;  %3413 = vtanh.f32 %v921_v56 }
 0x1e8   :  { %v4365_v9 = vpop.f32.mrf.mxu3 }
 0x1e9   :  { %v1546_v24 = vpop.f32.mrf.mxu1  ;;  %v2402_v60 = vpop.f32.mrf.mxu2 }
 0x1ea   :  { %v1547_v20 = vadd.f32 %v3910_v11, %v1546_v24  ;;  %v2403_v45 = vadd.f32 %v4142_v23, %v2402_v60  ;;  %v689_v34 = vpop.f32.mrf.mxu0  ;;  %v91_v60 = vld [vmem:[%s5467_s0 + $0x208] sm:$0xff] }
 0x1eb   :  { %v3412_v5 = vpop.eup %3411  ;;  %v690_v62 = vadd.f32 %v4198_v0, %v689_v34 }
 0x1ec   :  { %v1868_v8 = vmax.f32 %v1547_v20, 0.0  ;;  %2759 = vst.msk [vmem:[%s5473_s7 + $0x58] sm:$0xff] %vm2747_vm2, %v2403_v45  ;;  %3048 = vmatmul.msk.f32.gmra.mxu1 %vm1066_vm1, %v3412_v5  ;;  %v3414_v16 = vpop.eup %3413  ;;  %v1748_v45 = vadd.f32 %v4388_v25, %v4180_v38 }
 0x1ed   :  { %3415 = vtanh.f32 %v690_v62  ;;  %2939 = vmatmul.msk.f32.gmra.mxu0 %vm158_vm0, %v87_v13  ;;  %3126 = vmatmul.msk.f32.gmra.mxu3 %vm1066_vm1, %v3414_v16 }
 0x1ee   :  { %3158 = vmatmul.msk.f32.gmra.mxu2 %vm1066_vm1, %v1868_v8  ;;  %3417 = vtanh.f32 %v924_v36  ;;  %v1935_v38 = vmax.f32 %v1748_v45, 0.0 }
 0x1f0   :  { %v4383_v61 = vpop.f32.mrf.mxu3 }
 0x1f1   :  { %v1549_v14 = vpop.f32.mrf.mxu1  ;;  %v2405_v54 = vpop.f32.mrf.mxu2 }
 0x1f2   :  { %v1550_v32 = vadd.f32 %v3910_v11, %v1549_v14  ;;  %v2406_v17 = vadd.f32 %v4142_v23, %v2405_v54  ;;  %v692_v19 = vpop.f32.mrf.mxu0  ;;  %v927_v11 = vadd.f32 %v4198_v0, %v4144_v26  ;;  %v89_v26 = vld [vmem:[%s5467_s0 + $0x1f8] sm:$0xff]  ;;  %v92_v54 = vld [vmem:[%s5467_s0 + $0x210] sm:$0xff] }
 0x1f3   :  { %v3416_v47 = vpop.eup %3415  ;;  %v693_v10 = vadd.f32 %v4198_v0, %v692_v19 }
 0x1f4   :  { %v1869_v22 = vmax.f32 %v1550_v32, 0.0  ;;  %2760 = vst.msk [vmem:[%s5473_s7 + $0x60] sm:$0xff] %vm2747_vm2, %v2406_v17  ;;  %3049 = vmatmul.msk.f32.gmra.mxu1 %vm1066_vm1, %v3416_v47  ;;  %v3418_v27 = vpop.eup %3417  ;;  %v1751_v17 = vadd.f32 %v4388_v25, %v4203_v3 }
 0x1f5   :  { %3419 = vtanh.f32 %v693_v10  ;;  %2940 = vmatmul.msk.f32.gmra.mxu0 %vm158_vm0, %v88_v21  ;;  %3127 = vmatmul.msk.f32.gmra.mxu3 %vm1066_vm1, %v3418_v27 }
 0x1f6   :  { %3159 = vmatmul.msk.f32.gmra.mxu2 %vm1066_vm1, %v1869_v22  ;;  %3421 = vtanh.f32 %v927_v11  ;;  %v1936_v3 = vmax.f32 %v1751_v17, 0.0 }
 0x1f8   :  { %v4406_v31 = vpop.f32.mrf.mxu3 }
 0x1f9   :  { %v1552_v28 = vpop.f32.mrf.mxu1  ;;  %v2408_v29 = vpop.f32.mrf.mxu2 }
 0x1fa   :  { %v1553_v43 = vadd.f32 %v4388_v25, %v1552_v28  ;;  %v2409_v59 = vadd.f32 %v4142_v23, %v2408_v29  ;;  %v695_v57 = vpop.f32.mrf.mxu0  ;;  %v93_v29 = vld [vmem:[%s5467_s0 + $0x218] sm:$0xff] }
 0x1fb   :  { %v3420_v35 = vpop.eup %3419  ;;  %v696_v37 = vadd.f32 %v4198_v0, %v695_v57 }
 0x1fc   :  { %v1870_v4 = vmax.f32 %v1553_v43, 0.0  ;;  %2761 = vst.msk [vmem:[%s5473_s7 + $0x68] sm:$0xff] %vm2747_vm2, %v2409_v59  ;;  %3050 = vmatmul.msk.f32.gmra.mxu1 %vm1066_vm1, %v3420_v35  ;;  %v3422_v40 = vpop.eup %3421  ;;  %v1754_v59 = vadd.f32 %v4388_v25, %v4221_v18 }
 0x1fd   :  { %3423 = vtanh.f32 %v696_v37  ;;  %2941 = vmatmul.msk.f32.gmra.mxu0 %vm158_vm0, %v89_v26  ;;  %3128 = vmatmul.msk.f32.gmra.mxu3 %vm1066_vm1, %v3422_v40 }
 0x1fe   :  { %3160 = vmatmul.msk.f32.gmra.mxu2 %vm1066_vm1, %v1870_v4  ;;  %3425 = vtanh.f32 %v930_v41  ;;  %v1937_v18 = vmax.f32 %v1754_v59, 0.0 }
 0x200   :  { %v4422_v52 = vpop.f32.mrf.mxu3 }
 0x201   :  { %v1555_v42 = vpop.f32.mrf.mxu1  ;;  %v2411_v44 = vpop.f32.mrf.mxu2 }
 0x202   :  { %v1556_v53 = vadd.f32 %v4388_v25, %v1555_v42  ;;  %v2412_v46 = vadd.f32 %v4142_v23, %v2411_v44  ;;  %v698_v48 = vpop.f32.mrf.mxu0  ;;  %v94_v44 = vld [vmem:[%s5467_s0 + $0x220] sm:$0xff] }
 0x203   :  { %v3424_v49 = vpop.eup %3423  ;;  %v699_v39 = vadd.f32 %v4198_v0, %v698_v48 }
 0x204   :  { %v1871_v51 = vmax.f32 %v1556_v53, 0.0  ;;  %2762 = vst.msk [vmem:[%s5473_s7 + $0x70] sm:$0xff] %vm2747_vm2, %v2412_v46  ;;  %3051 = vmatmul.msk.f32.gmra.mxu1 %vm1066_vm1, %v3424_v49  ;;  %v3426_v55 = vpop.eup %3425  ;;  %v1757_v46 = vadd.f32 %v4388_v25, %v4239_v33 }
 0x205   :  { %3427 = vtanh.f32 %v699_v39  ;;  %2942 = vmatmul.msk.f32.gmra.mxu0 %vm158_vm0, %v90_v6  ;;  %3129 = vmatmul.msk.f32.gmra.mxu3 %vm1066_vm1, %v3426_v55 }
 0x206   :  { %3161 = vmatmul.msk.f32.gmra.mxu2 %vm1066_vm1, %v1871_v51  ;;  %v1938_v33 = vmax.f32 %v1757_v46, 0.0 }
 0x208   :  { %v4440_v5 = vpop.f32.mrf.mxu3 }
 0x209   :  { %v1558_v50 = vpop.f32.mrf.mxu1  ;;  %v2414_v7 = vpop.f32.mrf.mxu2 }
 0x20a   :  { %v1559_v56 = vadd.f32 %v4388_v25, %v1558_v50  ;;  %v2415_v2 = vadd.f32 %v4142_v23, %v2414_v7  ;;  %v701_v24 = vpop.f32.mrf.mxu0 }
 0x20b   :  { %v3428_v20 = vpop.eup %3427  ;;  %v702_v34 = vadd.f32 %v4198_v0, %v701_v24  ;;  %v1760_v24 = vadd.f32 %v4388_v25, %v4257_v12 }
 0x20c   :  { %v1872_v13 = vmax.f32 %v1559_v56, 0.0  ;;  %2763 = vst.msk [vmem:[%s5473_s7 + $0x78] sm:$0xff] %vm2747_vm2, %v2415_v2  ;;  %3052 = vmatmul.msk.f32.gmra.mxu1 %vm1066_vm1, %v3428_v20  ;;  %v95_v56 = vld [vmem:[%s5467_s0 + $0x228] sm:$0xff] }
 0x20d   :  { %3429 = vtanh.f32 %v702_v34  ;;  %2943 = vmatmul.msk.f32.gmra.mxu0 %vm158_vm0, %v91_v60  ;;  %3225 = vmatmul.msk.f32.vlgmr.msra.gmra.mxu3 %vm1066_vm1, %v1935_v38  ;;  %v1939_v12 = vmax.f32 %v1760_v24, 0.0 }
 0x20e   :  { %3162 = vmatmul.msk.f32.gmra.mxu2 %vm1066_vm1, %v1872_v13 }
 0x210   :  { %v4458_v47 = vpop.f32.mrf.mxu3 }
 0x211   :  { %v1561_v62 = vpop.f32.mrf.mxu1  ;;  %v2417_v8 = vpop.f32.mrf.mxu2 }
 0x212   :  { %v1562_v36 = vadd.f32 %v4388_v25, %v1561_v62  ;;  %v2418_v16 = vadd.f32 %v4142_v23, %v2417_v8  ;;  %v704_v14 = vpop.f32.mrf.mxu0 }
 0x213   :  { %v3430_v32 = vpop.eup %3429  ;;  %v705_v19 = vadd.f32 %v4198_v0, %v704_v14  ;;  %v1763_v14 = vadd.f32 %v4388_v25, %v4275_v63 }
 0x214   :  { %v1873_v21 = vmax.f32 %v1562_v36, 0.0  ;;  %2764 = vst.msk [vmem:[%s5473_s7 + $0x80] sm:$0xff] %vm2747_vm2, %v2418_v16  ;;  %3053 = vmatmul.msk.f32.gmra.mxu1 %vm1066_vm1, %v3430_v32  ;;  %v96_v36 = vld [vmem:[%s5467_s0 + $0x230] sm:$0xff] }
 0x215   :  { %3431 = vtanh.f32 %v705_v19  ;;  %2944 = vmatmul.msk.f32.gmra.mxu0 %vm158_vm0, %v92_v54  ;;  %3226 = vmatmul.msk.f32.gmra.mxu3 %vm1066_vm1, %v1936_v3  ;;  %v1940_v63 = vmax.f32 %v1763_v14, 0.0 }
 0x216   :  { %3163 = vmatmul.msk.f32.gmra.mxu2 %vm1066_vm1, %v1873_v21 }
 0x218   :  { %v4476_v35 = vpop.f32.mrf.mxu3 }
 0x219   :  { %v1564_v10 = vpop.f32.mrf.mxu1  ;;  %v2420_v22 = vpop.f32.mrf.mxu2 }
 0x21a   :  { %v1565_v11 = vadd.f32 %v4388_v25, %v1564_v10  ;;  %v2421_v27 = vadd.f32 %v4142_v23, %v2420_v22  ;;  %v707_v28 = vpop.f32.mrf.mxu0 }
 0x21b   :  { %v3432_v43 = vpop.eup %3431  ;;  %v708_v57 = vadd.f32 %v4198_v0, %v707_v28  ;;  %v1766_v28 = vadd.f32 %v4388_v25, %v4293_v15 }
 0x21c   :  { %v1874_v26 = vmax.f32 %v1565_v11, 0.0  ;;  %2765 = vst.msk [vmem:[%s5473_s7 + $0x88] sm:$0xff] %vm2747_vm2, %v2421_v27  ;;  %3054 = vmatmul.msk.f32.gmra.mxu1 %vm1066_vm1, %v3432_v43  ;;  %v97_v11 = vld [vmem:[%s5467_s0 + $0x238] sm:$0xff] }
 0x21d   :  { %3433 = vtanh.f32 %v708_v57  ;;  %2945 = vmatmul.msk.f32.gmra.mxu0 %vm158_vm0, %v93_v29  ;;  %3227 = vmatmul.msk.f32.gmra.mxu3 %vm1066_vm1, %v1937_v18  ;;  %v1941_v15 = vmax.f32 %v1766_v28, 0.0 }
 0x21e   :  { %3164 = vmatmul.msk.f32.gmra.mxu2 %vm1066_vm1, %v1874_v26 }
 0x220   :  { %v4494_v49 = vpop.f32.mrf.mxu3 }
 0x221   :  { %v1567_v37 = vpop.f32.mrf.mxu1  ;;  %v2423_v4 = vpop.f32.mrf.mxu2 }
 0x222   :  { %v1568_v41 = vadd.f32 %v4388_v25, %v1567_v37  ;;  %v2424_v40 = vadd.f32 %v4142_v23, %v2423_v4  ;;  %v710_v42 = vpop.f32.mrf.mxu0 }
 0x223   :  { %v3434_v53 = vpop.eup %3433  ;;  %v711_v48 = vadd.f32 %v4198_v0, %v710_v42  ;;  %v1769_v42 = vadd.f32 %v4388_v25, %v4311_v30 }
 0x224   :  { %v1875_v6 = vmax.f32 %v1568_v41, 0.0  ;;  %2766 = vst.msk [vmem:[%s5473_s7 + $0x90] sm:$0xff] %vm2747_vm2, %v2424_v40  ;;  %3055 = vmatmul.msk.f32.gmra.mxu1 %vm1066_vm1, %v3434_v53  ;;  %v98_v41 = vld [vmem:[%s5467_s0 + $0x240] sm:$0xff] }
 0x225   :  { %3435 = vtanh.f32 %v711_v48  ;;  %2946 = vmatmul.msk.f32.gmra.mxu0 %vm158_vm0, %v94_v44  ;;  %3228 = vmatmul.msk.f32.gmra.mxu3 %vm1066_vm1, %v1938_v33  ;;  %v1942_v30 = vmax.f32 %v1769_v42, 0.0 }
 0x226   :  { %3165 = vmatmul.msk.f32.gmra.mxu2 %vm1066_vm1, %v1875_v6 }
 0x228   :  { %v4512_v45 = vpop.f32.mrf.mxu3 }
 0x229   :  { %v1570_v39 = vpop.f32.mrf.mxu1  ;;  %v2426_v51 = vpop.f32.mrf.mxu2 }
 0x22a   :  { %v1571_v55 = vadd.f32 %v4388_v25, %v1570_v39  ;;  %v2427_v50 = vadd.f32 %v4142_v23, %v2426_v51  ;;  %v713_v7 = vpop.f32.mrf.mxu0 }
 0x22b   :  { %v3436_v2 = vpop.eup %3435  ;;  %v714_v60 = vadd.f32 %v4198_v0, %v713_v7  ;;  %v1772_v7 = vadd.f32 %v4388_v25, %v4329_v1 }
 0x22c   :  { %v1876_v20 = vmax.f32 %v1571_v55, 0.0  ;;  %2767 = vst.msk [vmem:[%s5473_s7 + $0x98] sm:$0xff] %vm2747_vm2, %v2427_v50  ;;  %3056 = vmatmul.msk.f32.gmra.mxu1 %vm1066_vm1, %v3436_v2  ;;  %v99_v55 = vld [vmem:[%s5467_s0 + $0x248] sm:$0xff] }
 0x22d   :  { %3437 = vtanh.f32 %v714_v60  ;;  %2947 = vmatmul.msk.f32.gmra.mxu0 %vm158_vm0, %v95_v56  ;;  %3229 = vmatmul.msk.f32.gmra.mxu3 %vm1066_vm1, %v1939_v12  ;;  %v1943_v1 = vmax.f32 %v1772_v7, 0.0 }
 0x22e   :  { %3166 = vmatmul.msk.f32.gmra.mxu2 %vm1066_vm1, %v1876_v20 }
 0x230   :  { %v4530_v17 = vpop.f32.mrf.mxu3 }
 0x231   :  { %v1573_v34 = vpop.f32.mrf.mxu1  ;;  %v2429_v13 = vpop.f32.mrf.mxu2 }
 0x232   :  { %v1574_v38 = vadd.f32 %v4388_v25, %v1573_v34  ;;  %v2430_v62 = vadd.f32 %v4142_v23, %v2429_v13  ;;  %v716_v8 = vpop.f32.mrf.mxu0 }
 0x233   :  { %v3438_v16 = vpop.eup %3437  ;;  %v717_v54 = vadd.f32 %v4198_v0, %v716_v8  ;;  %v1775_v8 = vadd.f32 %v4388_v25, %v4347_v58 }
 0x234   :  { %v1877_v32 = vmax.f32 %v1574_v38, 0.0  ;;  %2768 = vst.msk [vmem:[%s5473_s7 + $0xa0] sm:$0xff] %vm2747_vm2, %v2430_v62  ;;  %3057 = vmatmul.msk.f32.gmra.mxu1 %vm1066_vm1, %v3438_v16  ;;  %v100_v38 = vld [vmem:[%s5467_s0 + $0x250] sm:$0xff] }
 0x235   :  { %3439 = vtanh.f32 %v717_v54  ;;  %2948 = vmatmul.msk.f32.gmra.mxu0 %vm158_vm0, %v96_v36  ;;  %3230 = vmatmul.msk.f32.gmra.mxu3 %vm1066_vm1, %v1940_v63  ;;  %v1944_v58 = vmax.f32 %v1775_v8, 0.0 }
 0x236   :  { %3167 = vmatmul.msk.f32.gmra.mxu2 %vm1066_vm1, %v1877_v32 }
 0x238   :  { %v4548_v59 = vpop.f32.mrf.mxu3 }
 0x239   :  { %v1576_v19 = vpop.f32.mrf.mxu1  ;;  %v2432_v21 = vpop.f32.mrf.mxu2 }
 0x23a   :  { %v1577_v3 = vadd.f32 %v4388_v25, %v1576_v19  ;;  %v2433_v10 = vadd.f32 %v4142_v23, %v2432_v21  ;;  %v719_v22 = vpop.f32.mrf.mxu0 }
 0x23b   :  { %v3440_v27 = vpop.eup %3439  ;;  %v720_v29 = vadd.f32 %v4198_v0, %v719_v22  ;;  %v1778_v22 = vadd.f32 %v4388_v25, %v4365_v9 }
 0x23c   :  { %v1878_v43 = vmax.f32 %v1577_v3, 0.0  ;;  %2769 = vst.msk [vmem:[%s5473_s7 + $0xa8] sm:$0xff] %vm2747_vm2, %v2433_v10  ;;  %3058 = vmatmul.msk.f32.gmra.mxu1 %vm1066_vm1, %v3440_v27  ;;  %v101_v3 = vld [vmem:[%s5467_s0 + $0x258] sm:$0xff] }
 0x23d   :  { %3441 = vtanh.f32 %v720_v29  ;;  %2949 = vmatmul.msk.f32.gmra.mxu0 %vm158_vm0, %v97_v11  ;;  %3231 = vmatmul.msk.f32.gmra.mxu3 %vm1066_vm1, %v1941_v15  ;;  %v1945_v9 = vmax.f32 %v1778_v22, 0.0 }
 0x23e   :  { %3168 = vmatmul.msk.f32.gmra.mxu2 %vm1066_vm1, %v1878_v43 }
 0x240   :  { %v4566_v46 = vpop.f32.mrf.mxu3 }
 0x241   :  { %v1579_v57 = vpop.f32.mrf.mxu1  ;;  %v2435_v26 = vpop.f32.mrf.mxu2 }
 0x242   :  { %v1580_v18 = vadd.f32 %v4388_v25, %v1579_v57  ;;  %v2436_v37 = vadd.f32 %v4142_v23, %v2435_v26  ;;  %v722_v4 = vpop.f32.mrf.mxu0 }
 0x243   :  { %v3442_v40 = vpop.eup %3441  ;;  %v723_v44 = vadd.f32 %v4198_v0, %v722_v4  ;;  %v1781_v4 = vadd.f32 %v4388_v25, %v4383_v61 }
 0x244   :  { %v1879_v53 = vmax.f32 %v1580_v18, 0.0  ;;  %2770 = vst.msk [vmem:[%s5473_s7 + $0xb0] sm:$0xff] %vm2747_vm2, %v2436_v37  ;;  %3059 = vmatmul.msk.f32.gmra.mxu1 %vm1066_vm1, %v3442_v40  ;;  %v102_v18 = vld [vmem:[%s5467_s0 + $0x260] sm:$0xff] }
 0x245   :  { %3443 = vtanh.f32 %v723_v44  ;;  %2950 = vmatmul.msk.f32.gmra.mxu0 %vm158_vm0, %v98_v41  ;;  %3232 = vmatmul.msk.f32.gmra.mxu3 %vm1066_vm1, %v1942_v30  ;;  %v1946_v61 = vmax.f32 %v1781_v4, 0.0 }
 0x246   :  { %3169 = vmatmul.msk.f32.gmra.mxu2 %vm1066_vm1, %v1879_v53 }
 0x248   :  { %v4584_v24 = vpop.f32.mrf.mxu3 }
 0x249   :  { %v1582_v48 = vpop.f32.mrf.mxu1  ;;  %v2438_v6 = vpop.f32.mrf.mxu2 }
 0x24a   :  { %v1583_v33 = vadd.f32 %v4388_v25, %v1582_v48  ;;  %v2439_v39 = vadd.f32 %v4142_v23, %v2438_v6  ;;  %v725_v51 = vpop.f32.mrf.mxu0 }
 0x24b   :  { %v3444_v50 = vpop.eup %3443  ;;  %v726_v56 = vadd.f32 %v4198_v0, %v725_v51  ;;  %v1784_v51 = vadd.f32 %v4388_v25, %v4406_v31 }
 0x24c   :  { %v1880_v2 = vmax.f32 %v1583_v33, 0.0  ;;  %2771 = vst.msk [vmem:[%s5473_s7 + $0xb8] sm:$0xff] %vm2747_vm2, %v2439_v39  ;;  %3060 = vmatmul.msk.f32.gmra.mxu1 %vm1066_vm1, %v3444_v50  ;;  %v103_v33 = vld [vmem:[%s5467_s0 + $0x268] sm:$0xff] }
 0x24d   :  { %3445 = vtanh.f32 %v726_v56  ;;  %2951 = vmatmul.msk.f32.gmra.mxu0 %vm158_vm0, %v99_v55  ;;  %3233 = vmatmul.msk.f32.gmra.mxu3 %vm1066_vm1, %v1943_v1  ;;  %v1947_v31 = vmax.f32 %v1784_v51, 0.0  ;;  %v4662_v1 = vld [vmem:[%s5472_s6] ss:$0 sm:$0xff] }
 0x24e   :  { %3170 = vmatmul.msk.f32.gmra.mxu2 %vm1066_vm1, %v1880_v2 }
 0x250   :  { %v4602_v14 = vpop.f32.mrf.mxu3 }
 0x251   :  { %v1585_v60 = vpop.f32.mrf.mxu1  ;;  %v2441_v20 = vpop.f32.mrf.mxu2 }
 0x252   :  { %v1586_v12 = vadd.f32 %v4388_v25, %v1585_v60  ;;  %v2442_v34 = vadd.f32 %v4142_v23, %v2441_v20  ;;  %v728_v13 = vpop.f32.mrf.mxu0 }
 0x253   :  { %v3446_v62 = vpop.eup %3445  ;;  %v729_v36 = vadd.f32 %v4198_v0, %v728_v13  ;;  %v1787_v13 = vadd.f32 %v4388_v25, %v4422_v52 }
 0x254   :  { %v1881_v16 = vmax.f32 %v1586_v12, 0.0  ;;  %2772 = vst.msk [vmem:[%s5473_s7 + $0xc0] sm:$0xff] %vm2747_vm2, %v2442_v34  ;;  %3061 = vmatmul.msk.f32.gmra.mxu1 %vm1066_vm1, %v3446_v62  ;;  %v104_v12 = vld [vmem:[%s5467_s0 + $0x270] sm:$0xff] }
 0x255   :  { %3447 = vtanh.f32 %v729_v36  ;;  %2952 = vmatmul.msk.f32.gmra.mxu0 %vm158_vm0, %v100_v38  ;;  %3234 = vmatmul.msk.f32.gmra.mxu3 %vm1066_vm1, %v1944_v58  ;;  %v1948_v52 = vmax.f32 %v1787_v13, 0.0 }
 0x256   :  { %3171 = vmatmul.msk.f32.gmra.mxu2 %vm1066_vm1, %v1881_v16 }
 0x258   :  { %v4620_v28 = vpop.f32.mrf.mxu3 }
 0x259   :  { %v1588_v54 = vpop.f32.mrf.mxu1  ;;  %v2444_v32 = vpop.f32.mrf.mxu2 }
 0x25a   :  { %v1589_v63 = vadd.f32 %v4388_v25, %v1588_v54  ;;  %v2445_v19 = vadd.f32 %v4142_v23, %v2444_v32  ;;  %v731_v21 = vpop.f32.mrf.mxu0 }
 0x25b   :  { %v3448_v10 = vpop.eup %3447  ;;  %v732_v11 = vadd.f32 %v4198_v0, %v731_v21  ;;  %v1790_v21 = vadd.f32 %v4388_v25, %v4440_v5 }
 0x25c   :  { %v1882_v27 = vmax.f32 %v1589_v63, 0.0  ;;  %2773 = vst.msk [vmem:[%s5473_s7 + $0xc8] sm:$0xff] %vm2747_vm2, %v2445_v19  ;;  %3062 = vmatmul.msk.f32.gmra.mxu1 %vm1066_vm1, %v3448_v10  ;;  %v105_v63 = vld [vmem:[%s5467_s0 + $0x278] sm:$0xff] }
 0x25d   :  { %3449 = vtanh.f32 %v732_v11  ;;  %2953 = vmatmul.msk.f32.gmra.mxu0 %vm158_vm0, %v101_v3  ;;  %3235 = vmatmul.msk.f32.gmra.mxu3 %vm1066_vm1, %v1945_v9  ;;  %v1949_v5 = vmax.f32 %v1790_v21, 0.0 }
 0x25e   :  { %3172 = vmatmul.msk.f32.gmra.mxu2 %vm1066_vm1, %v1882_v27 }
 0x260   :  { %v4638_v42 = vpop.f32.mrf.mxu3 }
 0x261   :  { %v1591_v29 = vpop.f32.mrf.mxu1  ;;  %v2447_v43 = vpop.f32.mrf.mxu2 }
 0x262   :  { %v1592_v15 = vadd.f32 %v4388_v25, %v1591_v29  ;;  %v2448_v57 = vadd.f32 %v4142_v23, %v2447_v43  ;;  %v734_v26 = vpop.f32.mrf.mxu0 }
 0x263   :  { %v3450_v37 = vpop.eup %3449  ;;  %v735_v41 = vadd.f32 %v4198_v0, %v734_v26  ;;  %v1793_v26 = vadd.f32 %v4388_v25, %v4458_v47 }
 0x264   :  { %v1883_v40 = vmax.f32 %v1592_v15, 0.0  ;;  %2774 = vst.msk [vmem:[%s5473_s7 + $0xd0] sm:$0xff] %vm2747_vm2, %v2448_v57  ;;  %3063 = vmatmul.msk.f32.gmra.mxu1 %vm1066_vm1, %v3450_v37  ;;  %v106_v15 = vld [vmem:[%s5467_s0 + $0x280] sm:$0xff] }
 0x265   :  { %3451 = vtanh.f32 %v735_v41  ;;  %2954 = vmatmul.msk.f32.gmra.mxu0 %vm158_vm0, %v102_v18  ;;  %3236 = vmatmul.msk.f32.gmra.mxu3 %vm1066_vm1, %v1946_v61  ;;  %v1950_v47 = vmax.f32 %v1793_v26, 0.0 }
 0x266   :  { %3173 = vmatmul.msk.f32.gmra.mxu2 %vm1066_vm1, %v1883_v40 }
 0x269   :  { %v1594_v44 = vpop.f32.mrf.mxu1  ;;  %v2450_v53 = vpop.f32.mrf.mxu2 }
 0x26a   :  { %v1595_v30 = vadd.f32 %v4388_v25, %v1594_v44  ;;  %v2451_v48 = vadd.f32 %v4142_v23, %v2450_v53  ;;  %v737_v6 = vpop.f32.mrf.mxu0  ;;  %v4656_v23 = vpop.f32.mrf.mxu3  ;;  %v107_v53 = vld [vmem:[%s5467_s0 + $0x288] sm:$0xff] }
 0x26b   :  { %v3452_v39 = vpop.eup %3451  ;;  %v738_v55 = vadd.f32 %v4198_v0, %v737_v6  ;;  %v4727_v6 = vld [vmem:[%s5468_s2] ss:$0 sm:$0xff] }
 0x26c   :  { %v1884_v50 = vmax.f32 %v1595_v30, 0.0  ;;  %2775 = vst.msk [vmem:[%s5473_s7 + $0xd8] sm:$0xff] %vm2747_vm2, %v2451_v48  ;;  %3064 = vmatmul.msk.f32.gmra.mxu1 %vm1066_vm1, %v3452_v39  ;;  %v1796_v48 = vadd.f32 %v4388_v25, %v4476_v35 }
 0x26d   :  { %3453 = vtanh.f32 %v738_v55  ;;  %2955 = vmatmul.msk.f32.gmra.mxu0 %vm158_vm0, %v103_v33  ;;  %3237 = vmatmul.msk.f32.gmra.mxu3 %vm1066_vm1, %v1947_v31 }
 0x26e   :  { %3174 = vmatmul.msk.f32.gmra.mxu2 %vm1066_vm1, %v1884_v50  ;;  %v1951_v51 = vmax.f32 %v1796_v48, 0.0  ;;  %v1808_v48 = vadd.f32 %v4388_v25, %v4548_v59 }
 0x271   :  { %v1597_v7 = vpop.f32.mrf.mxu1  ;;  %v2453_v56 = vpop.f32.mrf.mxu2 }
 0x272   :  { %v1598_v2 = vadd.f32 %v4388_v25, %v1597_v7  ;;  %v2454_v60 = vadd.f32 %v4662_v1, %v2453_v56  ;;  %v740_v20 = vpop.f32.mrf.mxu0  ;;  %v4679_v8 = vpop.f32.mrf.mxu3 }
 0x273   :  { %v3454_v34 = vpop.eup %3453  ;;  %v741_v38 = vadd.f32 %v4198_v0, %v740_v20  ;;  %v1799_v20 = vadd.f32 %v4388_v25, %v4494_v49 }
 0x274   :  { %v1885_v62 = vmax.f32 %v1598_v2, 0.0  ;;  %2776 = vst.msk [vmem:[%s5473_s7 + $0xe0] sm:$0xff] %vm2747_vm2, %v2454_v60  ;;  %3065 = vmatmul.msk.f32.gmra.mxu1 %vm1066_vm1, %v3454_v34  ;;  %v108_v2 = vld [vmem:[%s5467_s0 + $0x290] sm:$0xff] }
 0x275   :  { %3455 = vtanh.f32 %v741_v38  ;;  %2956 = vmatmul.msk.f32.gmra.mxu0 %vm158_vm0, %v104_v12  ;;  %3238 = vmatmul.msk.f32.gmra.mxu3 %vm1066_vm1, %v1948_v52  ;;  %v1952_v38 = vmax.f32 %v1799_v20, 0.0 }
 0x276   :  { %3175 = vmatmul.msk.f32.gmra.mxu2 %vm1066_vm1, %v1885_v62 }
 0x279   :  { %v1600_v36 = vpop.f32.mrf.mxu1  ;;  %v2456_v16 = vpop.f32.mrf.mxu2 }
 0x27a   :  { %v1601_v58 = vadd.f32 %v4388_v25, %v1600_v36  ;;  %v2457_v54 = vadd.f32 %v4662_v1, %v2456_v16  ;;  %v743_v32 = vpop.f32.mrf.mxu0  ;;  %v4697_v22 = vpop.f32.mrf.mxu3 }
 0x27b   :  { %v3456_v19 = vpop.eup %3455  ;;  %v744_v3 = vadd.f32 %v4198_v0, %v743_v32 }
 0x27c   :  { %v1886_v10 = vmax.f32 %v1601_v58, 0.0  ;;  %2777 = vst.msk [vmem:[%s5473_s7 + $0xe8] sm:$0xff] %vm2747_vm2, %v2457_v54  ;;  %3066 = vmatmul.msk.f32.gmra.mxu1 %vm1066_vm1, %v3456_v19  ;;  %v109_v54 = vld [vmem:[%s5467_s0 + $0x298] sm:$0xff] }
 0x27d   :  { %3457 = vtanh.f32 %v744_v3  ;;  %2957 = vmatmul.msk.f32.gmra.mxu0 %vm158_vm0, %v105_v63  ;;  %3239 = vmatmul.msk.f32.gmra.mxu3 %vm1066_vm1, %v1949_v5  ;;  %v1802_v63 = vadd.f32 %v4388_v25, %v4512_v45 }
 0x27e   :  { %3176 = vmatmul.msk.f32.gmra.mxu2 %vm1066_vm1, %v1886_v10 }
 0x27f   :  { %v1953_v10 = vmax.f32 %v1802_v63, 0.0  ;;  %v1814_v63 = vadd.f32 %v4388_v25, %v4584_v24 }
 0x281   :  { %v1603_v11 = vpop.f32.mrf.mxu1  ;;  %v2459_v27 = vpop.f32.mrf.mxu2 }
 0x282   :  { %v1604_v9 = vadd.f32 %v4388_v25, %v1603_v11  ;;  %v2460_v29 = vadd.f32 %v4662_v1, %v2459_v27  ;;  %v746_v43 = vpop.f32.mrf.mxu0  ;;  %v4715_v4 = vpop.f32.mrf.mxu3 }
 0x283   :  { %v3458_v57 = vpop.eup %3457  ;;  %v747_v18 = vadd.f32 %v4198_v0, %v746_v43  ;;  %v110_v43 = vld [vmem:[%s5467_s0 + $0x2a0] sm:$0xff] }
 0x284   :  { %v1887_v37 = vmax.f32 %v1604_v9, 0.0  ;;  %2778 = vst.msk [vmem:[%s5473_s7 + $0xf0] sm:$0xff] %vm2747_vm2, %v2460_v29  ;;  %3067 = vmatmul.msk.f32.gmra.mxu1 %vm1066_vm1, %v3458_v57  ;;  %v1805_v57 = vadd.f32 %v4388_v25, %v4530_v17 }
 0x285   :  { %3459 = vtanh.f32 %v747_v18  ;;  %2958 = vmatmul.msk.f32.gmra.mxu0 %vm158_vm0, %v106_v15  ;;  %3240 = vmatmul.msk.f32.gmra.mxu3 %vm1066_vm1, %v1950_v47 }
 0x286   :  { %3177 = vmatmul.msk.f32.gmra.mxu2 %vm1066_vm1, %v1887_v37  ;;  %v1954_v47 = vmax.f32 %v1805_v57, 0.0 }
 0x289   :  { %v1606_v41 = vpop.f32.mrf.mxu1  ;;  %v2462_v0 = vpop.f32.mrf.mxu2 }
 0x28a   :  { %v1607_v40 = vadd.f32 %v4388_v25, %v1606_v41  ;;  %v2463_v61 = vadd.f32 %v4662_v1, %v2462_v0  ;;  %v749_v44 = vpop.f32.mrf.mxu0  ;;  %v4738_v35 = vpop.f32.mrf.mxu3 }
 0x28b   :  { %v3460_v30 = vpop.eup %3459  ;;  %v750_v33 = vadd.f32 %v4727_v6, %v749_v44 }
 0x28c   :  { %v1888_v39 = vmax.f32 %v1607_v40, 0.0  ;;  %2779 = vst.msk [vmem:[%s5473_s7 + $0xf8] sm:$0xff] %vm2747_vm2, %v2463_v61  ;;  %3068 = vmatmul.msk.f32.gmra.mxu1 %vm1066_vm1, %v3460_v30 }
 0x28d   :  { %3461 = vtanh.f32 %v750_v33  ;;  %2959 = vmatmul.msk.f32.gmra.mxu0 %vm158_vm0, %v107_v53  ;;  %3241 = vmatmul.msk.f32.gmra.mxu3 %vm1066_vm1, %v1951_v51  ;;  %v111_v53 = vld [vmem:[%s5467_s0 + $0x2a8] sm:$0xff] }
 0x28e   :  { %3178 = vmatmul.msk.f32.gmra.mxu2 %vm1066_vm1, %v1888_v39 }
 0x291   :  { %v1609_v55 = vpop.f32.mrf.mxu1  ;;  %v2465_v50 = vpop.f32.mrf.mxu2 }
 0x292   :  { %v1610_v31 = vadd.f32 %v4388_v25, %v1609_v55  ;;  %v2466_v7 = vadd.f32 %v4662_v1, %v2465_v50  ;;  %v752_v56 = vpop.f32.mrf.mxu0  ;;  %v2654_v13 = vpop.f32.mrf.mxu3  ;;  %v1955_v55 = vmax.f32 %v1808_v48, 0.0 }
 0x293   :  { %v3462_v60 = vpop.eup %3461  ;;  %v753_v12 = vadd.f32 %v4727_v6, %v752_v56  ;;  %v2655_v49 = vadd.f32 %v4662_v1, %v2654_v13 }
 0x294   :  { %v1889_v34 = vmax.f32 %v1610_v31, 0.0  ;;  %2780 = vst.msk [vmem:[%s5473_s7 + $0x100] sm:$0xff] %vm2747_vm2, %v2466_v7  ;;  %3069 = vmatmul.msk.f32.gmra.mxu1 %vm1066_vm1, %v3462_v60  ;;  %v112_v60 = vld [vmem:[%s5467_s0 + $0x2b0] sm:$0xff] }
 0x295   :  { %3463 = vtanh.f32 %v753_v12  ;;  %2960 = vmatmul.msk.f32.gmra.mxu0 %vm158_vm0, %v108_v2  ;;  %2843 = vst.msk [vmem:[%s5473_s7 + $0x2f8] sm:$0xff] %vm2747_vm2, %v2655_v49  ;;  %3242 = vmatmul.msk.f32.gmra.mxu3 %vm1066_vm1, %v1952_v38  ;;  %v1811_v12 = vadd.f32 %v4388_v25, %v4566_v46 }
 0x296   :  { %3179 = vmatmul.msk.f32.gmra.mxu2 %vm1066_vm1, %v1889_v34 }
 0x297   :  { %v1956_v49 = vmax.f32 %v1811_v12, 0.0 }
 0x299   :  { %v1612_v62 = vpop.f32.mrf.mxu1  ;;  %v2468_v52 = vpop.f32.mrf.mxu2 }
 0x29a   :  { %v1613_v36 = vadd.f32 %v4388_v25, %v1612_v62  ;;  %v2469_v16 = vadd.f32 %v4662_v1, %v2468_v52  ;;  %v755_v58 = vpop.f32.mrf.mxu0  ;;  %v2657_v3 = vpop.f32.mrf.mxu3 }
 0x29b   :  { %v3464_v32 = vpop.eup %3463  ;;  %v756_v19 = vadd.f32 %v4727_v6, %v755_v58  ;;  %v2658_v45 = vadd.f32 %v4662_v1, %v2657_v3 }
 0x29c   :  { %v1890_v21 = vmax.f32 %v1613_v36, 0.0  ;;  %2781 = vst.msk [vmem:[%s5473_s7 + $0x108] sm:$0xff] %vm2747_vm2, %v2469_v16  ;;  %3070 = vmatmul.msk.f32.gmra.mxu1 %vm1066_vm1, %v3464_v32 }
 0x29d   :  { %3465 = vtanh.f32 %v756_v19  ;;  %2961 = vmatmul.msk.f32.gmra.mxu0 %vm158_vm0, %v109_v54  ;;  %2844 = vst.msk [vmem:[%s5473_s7 + $0x300] sm:$0xff] %vm2747_vm2, %v2658_v45  ;;  %3243 = vmatmul.msk.f32.gmra.mxu3 %vm1066_vm1, %v1953_v10  ;;  %v113_v54 = vld [vmem:[%s5467_s0 + $0x2b8] sm:$0xff]  ;;  %v1957_v10 = vmax.f32 %v1814_v63, 0.0 }
 0x29e   :  { %3180 = vmatmul.msk.f32.gmra.mxu2 %vm1066_vm1, %v1890_v21 }
 0x2a1   :  { %v1615_v5 = vpop.f32.mrf.mxu1  ;;  %v2471_v11 = vpop.f32.mrf.mxu2 }
 0x2a2   :  { %v1616_v27 = vadd.f32 %v4388_v25, %v1615_v5  ;;  %v2472_v9 = vadd.f32 %v4662_v1, %v2471_v11  ;;  %v758_v29 = vpop.f32.mrf.mxu0  ;;  %v2660_v37 = vpop.f32.mrf.mxu3 }
 0x2a3   :  { %v3466_v15 = vpop.eup %3465  ;;  %v759_v26 = vadd.f32 %v4727_v6, %v758_v29  ;;  %v2661_v17 = vadd.f32 %v4662_v1, %v2660_v37  ;;  %v114_v29 = vld [vmem:[%s5467_s0 + $0x2c0] sm:$0xff] }
 0x2a4   :  { %v1891_v18 = vmax.f32 %v1616_v27, 0.0  ;;  %2782 = vst.msk [vmem:[%s5473_s7 + $0x110] sm:$0xff] %vm2747_vm2, %v2472_v9  ;;  %3071 = vmatmul.msk.f32.gmra.mxu1 %vm1066_vm1, %v3466_v15  ;;  %v1817_v15 = vadd.f32 %v4388_v25, %v4602_v14 }
 0x2a5   :  { %3467 = vtanh.f32 %v759_v26  ;;  %2962 = vmatmul.msk.f32.gmra.mxu0 %vm158_vm0, %v110_v43  ;;  %2845 = vst.msk [vmem:[%s5473_s7 + $0x308] sm:$0xff] %vm2747_vm2, %v2661_v17  ;;  %3244 = vmatmul.msk.f32.gmra.mxu3 %vm1066_vm1, %v1954_v47 }
 0x2a6   :  { %3181 = vmatmul.msk.f32.gmra.mxu2 %vm1066_vm1, %v1891_v18  ;;  %v1958_v37 = vmax.f32 %v1817_v15, 0.0 }
 0x2a9   :  { %v1618_v41 = vpop.f32.mrf.mxu1  ;;  %v2474_v0 = vpop.f32.mrf.mxu2 }
 0x2aa   :  { %v1619_v40 = vadd.f32 %v4388_v25, %v1618_v41  ;;  %v2475_v61 = vadd.f32 %v4662_v1, %v2474_v0  ;;  %v761_v44 = vpop.f32.mrf.mxu0  ;;  %v2663_v51 = vpop.f32.mrf.mxu3 }
 0x2ab   :  { %v3468_v30 = vpop.eup %3467  ;;  %v762_v33 = vadd.f32 %v4727_v6, %v761_v44  ;;  %v2664_v59 = vadd.f32 %v4662_v1, %v2663_v51 }
 0x2ac   :  { %v1892_v39 = vmax.f32 %v1619_v40, 0.0  ;;  %2783 = vst.msk [vmem:[%s5473_s7 + $0x118] sm:$0xff] %vm2747_vm2, %v2475_v61  ;;  %3072 = vmatmul.msk.f32.gmra.mxu1 %vm1066_vm1, %v3468_v30  ;;  %v115_v61 = vld [vmem:[%s5467_s0 + $0x2c8] sm:$0xff] }
 0x2ad   :  { %3469 = vtanh.f32 %v762_v33  ;;  %2963 = vmatmul.msk.f32.gmra.mxu0 %vm158_vm0, %v111_v53  ;;  %2846 = vst.msk [vmem:[%s5473_s7 + $0x310] sm:$0xff] %vm2747_vm2, %v2664_v59  ;;  %3245 = vmatmul.msk.f32.gmra.mxu3 %vm1066_vm1, %v1955_v55  ;;  %v1820_v53 = vadd.f32 %v4388_v25, %v4620_v28 }
 0x2ae   :  { %3182 = vmatmul.msk.f32.gmra.mxu2 %vm1066_vm1, %v1892_v39 }
 0x2af   :  { %v1959_v39 = vmax.f32 %v1820_v53, 0.0 }
 0x2b1   :  { %v1621_v50 = vpop.f32.mrf.mxu1  ;;  %v2477_v31 = vpop.f32.mrf.mxu2 }
 0x2b2   :  { %v1622_v7 = vadd.f32 %v4388_v25, %v1621_v50  ;;  %v2478_v56 = vadd.f32 %v4662_v1, %v2477_v31  ;;  %v764_v2 = vpop.f32.mrf.mxu0  ;;  %v2666_v38 = vpop.f32.mrf.mxu3 }
 0x2b3   :  { %v3470_v20 = vpop.eup %3469  ;;  %v765_v34 = vadd.f32 %v4727_v6, %v764_v2  ;;  %v2667_v46 = vadd.f32 %v4662_v1, %v2666_v38  ;;  %v1823_v2 = vadd.f32 %v4388_v25, %v4638_v42  ;;  %v4932_v38 = vld [vmem:[%s5470_s4] ss:$0 sm:$0xff] }
 0x2b4   :  { %v1893_v13 = vmax.f32 %v1622_v7, 0.0  ;;  %2784 = vst.msk [vmem:[%s5473_s7 + $0x120] sm:$0xff] %vm2747_vm2, %v2478_v56  ;;  %3073 = vmatmul.msk.f32.gmra.mxu1 %vm1066_vm1, %v3470_v20  ;;  %v116_v7 = vld [vmem:[%s5467_s0 + $0x2d0] sm:$0xff] }
 0x2b5   :  { %3471 = vtanh.f32 %v765_v34  ;;  %2964 = vmatmul.msk.f32.gmra.mxu0 %vm158_vm0, %v112_v60  ;;  %2847 = vst.msk [vmem:[%s5473_s7 + $0x318] sm:$0xff] %vm2747_vm2, %v2667_v46  ;;  %3246 = vmatmul.msk.f32.gmra.mxu3 %vm1066_vm1, %v1956_v49  ;;  %v1960_v34 = vmax.f32 %v1823_v2, 0.0 }
 0x2b6   :  { %3183 = vmatmul.msk.f32.gmra.mxu2 %vm1066_vm1, %v1893_v13 }
 0x2b9   :  { %v1624_v62 = vpop.f32.mrf.mxu1  ;;  %v2480_v52 = vpop.f32.mrf.mxu2 }
 0x2ba   :  { %v1625_v36 = vadd.f32 %v4388_v25, %v1624_v62  ;;  %v2481_v16 = vadd.f32 %v4662_v1, %v2480_v52  ;;  %v767_v58 = vpop.f32.mrf.mxu0  ;;  %v2669_v3 = vpop.f32.mrf.mxu3  ;;  %v117_v52 = vld [vmem:[%s5467_s0 + $0x2d8] sm:$0xff] }
 0x2bb   :  { %v3472_v32 = vpop.eup %3471  ;;  %v768_v19 = vadd.f32 %v4727_v6, %v767_v58  ;;  %v2670_v24 = vadd.f32 %v4662_v1, %v2669_v3 }
 0x2bc   :  { %v1894_v21 = vmax.f32 %v1625_v36, 0.0  ;;  %2785 = vst.msk [vmem:[%s5473_s7 + $0x128] sm:$0xff] %vm2747_vm2, %v2481_v16  ;;  %3074 = vmatmul.msk.f32.gmra.mxu1 %vm1066_vm1, %v3472_v32  ;;  %v1826_v16 = vadd.f32 %v4932_v38, %v4656_v23 }
 0x2bd   :  { %3473 = vtanh.f32 %v768_v19  ;;  %2965 = vmatmul.msk.f32.gmra.mxu0 %vm158_vm0, %v113_v54  ;;  %2848 = vst.msk [vmem:[%s5473_s7 + $0x320] sm:$0xff] %vm2747_vm2, %v2670_v24  ;;  %3247 = vmatmul.msk.f32.gmra.mxu3 %vm1066_vm1, %v1957_v10 }
 0x2be   :  { %3184 = vmatmul.msk.f32.gmra.mxu2 %vm1066_vm1, %v1894_v21  ;;  %v1961_v63 = vmax.f32 %v1826_v16, 0.0 }
 0x2c1   :  { %v1627_v45 = vpop.f32.mrf.mxu1  ;;  %v2483_v5 = vpop.f32.mrf.mxu2 }
 0x2c2   :  { %v1628_v11 = vadd.f32 %v4388_v25, %v1627_v45  ;;  %v2484_v27 = vadd.f32 %v4662_v1, %v2483_v5  ;;  %v770_v9 = vpop.f32.mrf.mxu0  ;;  %v2672_v18 = vpop.f32.mrf.mxu3  ;;  %v118_v45 = vld [vmem:[%s5467_s0 + $0x2e0] sm:$0xff] }
 0x2c3   :  { %v3474_v43 = vpop.eup %3473  ;;  %v771_v57 = vadd.f32 %v4727_v6, %v770_v9  ;;  %v2673_v14 = vadd.f32 %v4662_v1, %v2672_v18 }
 0x2c4   :  { %v1895_v26 = vmax.f32 %v1628_v11, 0.0  ;;  %2786 = vst.msk [vmem:[%s5473_s7 + $0x130] sm:$0xff] %vm2747_vm2, %v2484_v27  ;;  %3075 = vmatmul.msk.f32.gmra.mxu1 %vm1066_vm1, %v3474_v43  ;;  %v1829_v11 = vadd.f32 %v4932_v38, %v4679_v8 }
 0x2c5   :  { %3475 = vtanh.f32 %v771_v57  ;;  %2966 = vmatmul.msk.f32.gmra.mxu0 %vm158_vm0, %v114_v29  ;;  %2849 = vst.msk [vmem:[%s5473_s7 + $0x328] sm:$0xff] %vm2747_vm2, %v2673_v14  ;;  %3248 = vmatmul.msk.f32.gmra.mxu3 %vm1066_vm1, %v1958_v37  ;;  %v119_v14 = vld [vmem:[%s5467_s0 + $0x2e8] sm:$0xff] }
 0x2c6   :  { %3185 = vmatmul.msk.f32.gmra.mxu2 %vm1066_vm1, %v1895_v26  ;;  %v1962_v43 = vmax.f32 %v1829_v11, 0.0 }
 0x2c9   :  { %v1630_v47 = vpop.f32.mrf.mxu1  ;;  %v2486_v17 = vpop.f32.mrf.mxu2 }
 0x2ca   :  { %v1631_v41 = vadd.f32 %v4388_v25, %v1630_v47  ;;  %v2487_v0 = vadd.f32 %v4662_v1, %v2486_v17  ;;  %v773_v40 = vpop.f32.mrf.mxu0  ;;  %v2675_v33 = vpop.f32.mrf.mxu3  ;;  %v1832_v17 = vadd.f32 %v4932_v38, %v4697_v22 }
 0x2cb   :  { %v3476_v44 = vpop.eup %3475  ;;  %v774_v30 = vadd.f32 %v4727_v6, %v773_v40  ;;  %v2676_v28 = vadd.f32 %v4662_v1, %v2675_v33 }
 0x2cc   :  { %v1896_v48 = vmax.f32 %v1631_v41, 0.0  ;;  %2787 = vst.msk [vmem:[%s5473_s7 + $0x138] sm:$0xff] %vm2747_vm2, %v2487_v0  ;;  %3076 = vmatmul.msk.f32.gmra.mxu1 %vm1066_vm1, %v3476_v44 }
 0x2cd   :  { %3477 = vtanh.f32 %v774_v30  ;;  %2967 = vmatmul.msk.f32.gmra.mxu0 %vm158_vm0, %v115_v61  ;;  %2850 = vst.msk [vmem:[%s5473_s7 + $0x330] sm:$0xff] %vm2747_vm2, %v2676_v28  ;;  %3249 = vmatmul.msk.f32.gmra.mxu3 %vm1066_vm1, %v1959_v39  ;;  %v1963_v61 = vmax.f32 %v1832_v17, 0.0  ;;  %v120_v39 = vld [vmem:[%s5467_s0 + $0x2f0] sm:$0xff] }
 0x2ce   :  { %3186 = vmatmul.msk.f32.gmra.mxu2 %vm1066_vm1, %v1896_v48 }
 0x2d1   :  { %v1633_v51 = vpop.f32.mrf.mxu1  ;;  %v2489_v55 = vpop.f32.mrf.mxu2 }
 0x2d2   :  { %v1634_v59 = vadd.f32 %v4388_v25, %v1633_v51  ;;  %v2490_v50 = vadd.f32 %v4662_v1, %v2489_v55  ;;  %v776_v31 = vpop.f32.mrf.mxu0  ;;  %v2678_v12 = vpop.f32.mrf.mxu3  ;;  %v1835_v51 = vadd.f32 %v4932_v38, %v4715_v4 }
 0x2d3   :  { %v3478_v56 = vpop.eup %3477  ;;  %v777_v60 = vadd.f32 %v4727_v6, %v776_v31  ;;  %v2679_v25 = vadd.f32 %v4662_v1, %v2678_v12 }
 0x2d4   :  { %v1897_v20 = vmax.f32 %v1634_v59, 0.0  ;;  %2788 = vst.msk [vmem:[%s5473_s7 + $0x140] sm:$0xff] %vm2747_vm2, %v2490_v50  ;;  %3077 = vmatmul.msk.f32.gmra.mxu1 %vm1066_vm1, %v3478_v56  ;;  %v1964_v31 = vmax.f32 %v1835_v51, 0.0 }
 0x2d5   :  { %3479 = vtanh.f32 %v777_v60  ;;  %2968 = vmatmul.msk.f32.gmra.mxu0 %vm158_vm0, %v116_v7  ;;  %2851 = vst.msk [vmem:[%s5473_s7 + $0x338] sm:$0xff] %vm2747_vm2, %v2679_v25  ;;  %3250 = vmatmul.msk.f32.gmra.mxu3 %vm1066_vm1, %v1960_v34  ;;  %v1838_v34 = vadd.f32 %v4932_v38, %v4738_v35 }
 0x2d6   :  { %3187 = vmatmul.msk.f32.gmra.mxu2 %vm1066_vm1, %v1897_v20 }
 0x2d9   :  { %v1636_v42 = vpop.f32.mrf.mxu1  ;;  %v2492_v13 = vpop.f32.mrf.mxu2 }
 0x2da   :  { %v1637_v49 = vadd.f32 %v4932_v38, %v1636_v42  ;;  %v2493_v46 = vadd.f32 %v4662_v1, %v2492_v13  ;;  %v779_v62 = vpop.f32.mrf.mxu0  ;;  %v2681_v32 = vpop.f32.mrf.mxu3 }
 0x2db   :  { %v3480_v36 = vpop.eup %3479  ;;  %v780_v58 = vadd.f32 %v4727_v6, %v779_v62  ;;  %v2682_v23 = vadd.f32 %v4662_v1, %v2681_v32 }
 0x2dc   :  { %v1898_v54 = vmax.f32 %v1637_v49, 0.0  ;;  %2789 = vst.msk [vmem:[%s5473_s7 + $0x148] sm:$0xff] %vm2747_vm2, %v2493_v46  ;;  %3078 = vmatmul.msk.f32.gmra.mxu1 %vm1066_vm1, %v3480_v36  ;;  %v1965_v49 = vmax.f32 %v1838_v34, 0.0 }
 0x2dd   :  { %3481 = vtanh.f32 %v780_v58  ;;  %2969 = vmatmul.msk.f32.gmra.mxu0 %vm158_vm0, %v117_v52  ;;  %2852 = vst.msk [vmem:[%s5473_s7 + $0x340] sm:$0xff] %vm2747_vm2, %v2682_v23  ;;  %3251 = vmatmul.msk.f32.gmra.mxu3 %vm1066_vm1, %v1961_v63 }
 0x2de   :  { %3188 = vmatmul.msk.f32.gmra.mxu2 %vm1066_vm1, %v1898_v54 }
 0x2e1   :  { %v1639_v19 = vpop.f32.mrf.mxu1  ;;  %v2495_v21 = vpop.f32.mrf.mxu2 }
 0x2e2   :  { %v1640_v3 = vadd.f32 %v4932_v38, %v1639_v19  ;;  %v2496_v10 = vadd.f32 %v4662_v1, %v2495_v21  ;;  %v782_v24 = vpop.f32.mrf.mxu0  ;;  %v2684_v29 = vpop.f32.mrf.mxu3 }
 0x2e3   :  { %v3482_v5 = vpop.eup %3481  ;;  %v783_v27 = vadd.f32 %v4727_v6, %v782_v24  ;;  %v2685_v8 = vadd.f32 %v4662_v1, %v2684_v29 }
 0x2e4   :  { %v1899_v9 = vmax.f32 %v1640_v3, 0.0  ;;  %2790 = vst.msk [vmem:[%s5473_s7 + $0x150] sm:$0xff] %vm2747_vm2, %v2496_v10  ;;  %3079 = vmatmul.msk.f32.gmra.mxu1 %vm1066_vm1, %v3482_v5 }
 0x2e5   :  { %3483 = vtanh.f32 %v783_v27  ;;  %2970 = vmatmul.msk.f32.gmra.mxu0 %vm158_vm0, %v118_v45  ;;  %2853 = vst.msk [vmem:[%s5473_s7 + $0x348] sm:$0xff] %vm2747_vm2, %v2685_v8  ;;  %3252 = vmatmul.msk.f32.gmra.mxu3 %vm1066_vm1, %v1962_v43 }
 0x2e6   :  { %3189 = vmatmul.msk.f32.gmra.mxu2 %vm1066_vm1, %v1899_v9 }
 0x2e9   :  { %v1642_v15 = vpop.f32.mrf.mxu1  ;;  %v2498_v57 = vpop.f32.mrf.mxu2 }
 0x2ea   :  { %v1643_v26 = vadd.f32 %v4932_v38, %v1642_v15  ;;  %v2499_v18 = vadd.f32 %v4662_v1, %v2498_v57  ;;  %v785_v37 = vpop.f32.mrf.mxu0  ;;  %v2687_v40 = vpop.f32.mrf.mxu3 }
 0x2eb   :  { %v3484_v47 = vpop.eup %3483  ;;  %v786_v41 = vadd.f32 %v4727_v6, %v785_v37  ;;  %v2688_v22 = vadd.f32 %v4662_v1, %v2687_v40 }
 0x2ec   :  { %v1900_v0 = vmax.f32 %v1643_v26, 0.0  ;;  %2791 = vst.msk [vmem:[%s5473_s7 + $0x158] sm:$0xff] %vm2747_vm2, %v2499_v18  ;;  %3080 = vmatmul.msk.f32.gmra.mxu1 %vm1066_vm1, %v3484_v47 }
 0x2ed   :  { %3485 = vtanh.f32 %v786_v41  ;;  %2971 = vmatmul.msk.f32.gmra.mxu0 %vm158_vm0, %v119_v14  ;;  %2854 = vst.msk [vmem:[%s5473_s7 + $0x350] sm:$0xff] %vm2747_vm2, %v2688_v22  ;;  %3253 = vmatmul.msk.f32.gmra.mxu3 %vm1066_vm1, %v1963_v61 }
 0x2ee   :  { %3190 = vmatmul.msk.f32.gmra.mxu2 %vm1066_vm1, %v1900_v0 }
 0x2f1   :  { %v1645_v44 = vpop.f32.mrf.mxu1  ;;  %v2501_v53 = vpop.f32.mrf.mxu2 }
 0x2f2   :  { %v1646_v30 = vadd.f32 %v4932_v38, %v1645_v44  ;;  %v2502_v48 = vadd.f32 %v4662_v1, %v2501_v53  ;;  %v788_v33 = vpop.f32.mrf.mxu0  ;;  %v2690_v50 = vpop.f32.mrf.mxu3 }
 0x2f3   :  { %v3486_v28 = vpop.eup %3485  ;;  %v789_v55 = vadd.f32 %v4727_v6, %v788_v33  ;;  %v2691_v4 = vadd.f32 %v4662_v1, %v2690_v50 }
 0x2f4   :  { %v1901_v59 = vmax.f32 %v1646_v30, 0.0  ;;  %2792 = vst.msk [vmem:[%s5473_s7 + $0x160] sm:$0xff] %vm2747_vm2, %v2502_v48  ;;  %3081 = vmatmul.msk.f32.gmra.mxu1 %vm1066_vm1, %v3486_v28 }
 0x2f5   :  { %3487 = vtanh.f32 %v789_v55  ;;  %2972 = vmatmul.msk.f32.gmra.mxu0 %vm158_vm0, %v120_v39  ;;  %2855 = vst.msk [vmem:[%s5473_s7 + $0x358] sm:$0xff] %vm2747_vm2, %v2691_v4  ;;  %3254 = vmatmul.msk.f32.gmra.mxu3 %vm1066_vm1, %v1964_v31 }
 0x2f6   :  { %3191 = vmatmul.msk.f32.gmra.mxu2 %vm1066_vm1, %v1901_v59 }
 0x2f9   :  { %v1648_v7 = vpop.f32.mrf.mxu1  ;;  %v2504_v56 = vpop.f32.mrf.mxu2 }
 0x2fa   :  { %v1649_v2 = vadd.f32 %v4932_v38, %v1648_v7  ;;  %v2505_v60 = vadd.f32 %v4662_v1, %v2504_v56  ;;  %v791_v20 = vpop.f32.mrf.mxu0  ;;  %v2693_v13 = vpop.f32.mrf.mxu3 }
 0x2fb   :  { %v3488_v12 = vpop.eup %3487  ;;  %v792_v25 = vadd.f32 %v4727_v6, %v791_v20  ;;  %v2694_v46 = vadd.f32 %v4662_v1, %v2693_v13 }
 0x2fc   :  { %v1902_v42 = vmax.f32 %v1649_v2, 0.0  ;;  %2793 = vst.msk [vmem:[%s5473_s7 + $0x168] sm:$0xff] %vm2747_vm2, %v2505_v60  ;;  %3082 = vmatmul.msk.f32.gmra.mxu1 %vm1066_vm1, %v3488_v12 }
 0x2fd   :  { %3489 = vtanh.f32 %v792_v25  ;;  %2856 = vst.msk [vmem:[%s5473_s7 + $0x360] sm:$0xff] %vm2747_vm2, %v2694_v46  ;;  %3255 = vmatmul.msk.f32.gmra.mxu3 %vm1066_vm1, %v1965_v49 }
 0x2fe   :  { %3192 = vmatmul.msk.f32.gmra.mxu2 %vm1066_vm1, %v1902_v42 }
 0x301   :  { %v1651_v35 = vpop.f32.mrf.mxu1  ;;  %v2507_v62 = vpop.f32.mrf.mxu2 }
 0x302   :  { %v1652_v52 = vadd.f32 %v4932_v38, %v1651_v35  ;;  %v2508_v36 = vadd.f32 %v4662_v1, %v2507_v62  ;;  %v794_v16 = vpop.f32.mrf.mxu0  ;;  %v2696_v63 = vpop.f32.mrf.mxu3 }
 0x303   :  { %v3490_v58 = vpop.eup %3489  ;;  %v795_v54 = vadd.f32 %v4727_v6, %v794_v16  ;;  %v2697_v23 = vadd.f32 %v4662_v1, %v2696_v63 }
 0x304   :  { %v1903_v32 = vmax.f32 %v1652_v52, 0.0  ;;  %2794 = vst.msk [vmem:[%s5473_s7 + $0x170] sm:$0xff] %vm2747_vm2, %v2508_v36  ;;  %3083 = vmatmul.msk.f32.gmra.mxu1 %vm1066_vm1, %v3490_v58 }
 0x305   :  { %3491 = vtanh.f32 %v795_v54  ;;  %2857 = vst.msk [vmem:[%s5473_s7 + $0x368] sm:$0xff] %vm2747_vm2, %v2697_v23 }
 0x306   :  { %3193 = vmatmul.msk.f32.gmra.mxu2 %vm1066_vm1, %v1903_v32 }
 0x309   :  { %v1654_v19 = vpop.f32.mrf.mxu1  ;;  %v2510_v21 = vpop.f32.mrf.mxu2 }
 0x30a   :  { %v1655_v3 = vadd.f32 %v4932_v38, %v1654_v19  ;;  %v2511_v10 = vadd.f32 %v4662_v1, %v2510_v21  ;;  %v797_v24 = vpop.f32.mrf.mxu0  ;;  %v2699_v27 = vpop.f32.mrf.mxu3 }
 0x30b   :  { %v3492_v45 = vpop.eup %3491  ;;  %v798_v5 = vadd.f32 %v4727_v6, %v797_v24  ;;  %v2700_v9 = vadd.f32 %v4662_v1, %v2699_v27 }
 0x30c   :  { %v1904_v11 = vmax.f32 %v1655_v3, 0.0  ;;  %2795 = vst.msk [vmem:[%s5473_s7 + $0x178] sm:$0xff] %vm2747_vm2, %v2511_v10  ;;  %3084 = vmatmul.msk.f32.gmra.mxu1 %vm1066_vm1, %v3492_v45 }
 0x30d   :  { %3493 = vtanh.f32 %v798_v5  ;;  %2858 = vst.msk [vmem:[%s5473_s7 + $0x370] sm:$0xff] %vm2747_vm2, %v2700_v9 }
 0x30e   :  { %3194 = vmatmul.msk.f32.gmra.mxu2 %vm1066_vm1, %v1904_v11 }
 0x311   :  { %v1657_v29 = vpop.f32.mrf.mxu1  ;;  %v2513_v43 = vpop.f32.mrf.mxu2 }
 0x312   :  { %v1658_v8 = vadd.f32 %v4932_v38, %v1657_v29  ;;  %v2514_v15 = vadd.f32 %v4662_v1, %v2513_v43  ;;  %v800_v57 = vpop.f32.mrf.mxu0  ;;  %v2702_v14 = vpop.f32.mrf.mxu3 }
 0x313   :  { %v3494_v26 = vpop.eup %3493  ;;  %v801_v18 = vadd.f32 %v4727_v6, %v800_v57  ;;  %v2703_v47 = vadd.f32 %v4662_v1, %v2702_v14 }
 0x314   :  { %v1905_v37 = vmax.f32 %v1658_v8, 0.0  ;;  %2796 = vst.msk [vmem:[%s5473_s7 + $0x180] sm:$0xff] %vm2747_vm2, %v2514_v15  ;;  %3085 = vmatmul.msk.f32.gmra.mxu1 %vm1066_vm1, %v3494_v26 }
 0x315   :  { %3495 = vtanh.f32 %v801_v18  ;;  %2859 = vst.msk [vmem:[%s5473_s7 + $0x378] sm:$0xff] %vm2747_vm2, %v2703_v47 }
 0x316   :  { %3195 = vmatmul.msk.f32.gmra.mxu2 %vm1066_vm1, %v1905_v37 }
 0x319   :  { %v1660_v17 = vpop.f32.mrf.mxu1  ;;  %v2516_v41 = vpop.f32.mrf.mxu2 }
 0x31a   :  { %v1661_v0 = vadd.f32 %v4932_v38, %v1660_v17  ;;  %v2517_v40 = vadd.f32 %v4662_v1, %v2516_v41  ;;  %v803_v61 = vpop.f32.mrf.mxu0  ;;  %v2705_v30 = vpop.f32.mrf.mxu3 }
 0x31b   :  { %v3496_v22 = vpop.eup %3495  ;;  %v804_v44 = vadd.f32 %v4727_v6, %v803_v61  ;;  %v2706_v48 = vadd.f32 %v4662_v1, %v2705_v30 }
 0x31c   :  { %v1906_v53 = vmax.f32 %v1661_v0, 0.0  ;;  %2797 = vst.msk [vmem:[%s5473_s7 + $0x188] sm:$0xff] %vm2747_vm2, %v2517_v40  ;;  %3086 = vmatmul.msk.f32.gmra.mxu1 %vm1066_vm1, %v3496_v22 }
 0x31d   :  { %3497 = vtanh.f32 %v804_v44  ;;  %2860 = vst.msk [vmem:[%s5473_s7 + $0x380] sm:$0xff] %vm2747_vm2, %v2706_v48 }
 0x31e   :  { %3196 = vmatmul.msk.f32.gmra.mxu2 %vm1066_vm1, %v1906_v53 }
 0x321   :  { %v1663_v33 = vpop.f32.mrf.mxu1  ;;  %v2519_v39 = vpop.f32.mrf.mxu2 }
 0x322   :  { %v1664_v28 = vadd.f32 %v4932_v38, %v1663_v33  ;;  %v2520_v51 = vadd.f32 %v4662_v1, %v2519_v39  ;;  %v806_v55 = vpop.f32.mrf.mxu0  ;;  %v2708_v4 = vpop.f32.mrf.mxu3 }
 0x323   :  { %v3498_v59 = vpop.eup %3497  ;;  %v807_v50 = vadd.f32 %v4727_v6, %v806_v55  ;;  %v2709_v7 = vadd.f32 %v4662_v1, %v2708_v4 }
 0x324   :  { %v1907_v31 = vmax.f32 %v1664_v28, 0.0  ;;  %2798 = vst.msk [vmem:[%s5473_s7 + $0x190] sm:$0xff] %vm2747_vm2, %v2520_v51  ;;  %3087 = vmatmul.msk.f32.gmra.mxu1 %vm1066_vm1, %v3498_v59 }
 0x325   :  { %3499 = vtanh.f32 %v807_v50  ;;  %2861 = vst.msk [vmem:[%s5473_s7 + $0x388] sm:$0xff] %vm2747_vm2, %v2709_v7 }
 0x326   :  { %3197 = vmatmul.msk.f32.gmra.mxu2 %vm1066_vm1, %v1907_v31 }
 0x329   :  { %v1666_v56 = vpop.f32.mrf.mxu1  ;;  %v2522_v2 = vpop.f32.mrf.mxu2 }
 0x32a   :  { %v1667_v60 = vadd.f32 %v4932_v38, %v1666_v56  ;;  %v2523_v20 = vadd.f32 %v4662_v1, %v2522_v2  ;;  %v809_v12 = vpop.f32.mrf.mxu0  ;;  %v2711_v13 = vpop.f32.mrf.mxu3 }
 0x32b   :  { %v3500_v34 = vpop.eup %3499  ;;  %v810_v25 = vadd.f32 %v4727_v6, %v809_v12  ;;  %v2712_v49 = vadd.f32 %v4662_v1, %v2711_v13 }
 0x32c   :  { %v1908_v42 = vmax.f32 %v1667_v60, 0.0  ;;  %2799 = vst.msk [vmem:[%s5473_s7 + $0x198] sm:$0xff] %vm2747_vm2, %v2523_v20  ;;  %3088 = vmatmul.msk.f32.gmra.mxu1 %vm1066_vm1, %v3500_v34  ;;  %v5194_v60 = vld [vmem:[%s5472_s6] ss:$0 sm:$0xff] }
 0x32d   :  { %3501 = vtanh.f32 %v810_v25  ;;  %2862 = vst.msk [vmem:[%s5473_s7 + $0x390] sm:$0xff] %vm2747_vm2, %v2712_v49 }
 0x32e   :  { %3198 = vmatmul.msk.f32.gmra.mxu2 %vm1066_vm1, %v1908_v42 }
 0x331   :  { %v1669_v46 = vpop.f32.mrf.mxu1  ;;  %v2525_v35 = vpop.f32.mrf.mxu2 }
 0x332   :  { %v1670_v62 = vadd.f32 %v4932_v38, %v1669_v46  ;;  %v2526_v52 = vadd.f32 %v4662_v1, %v2525_v35  ;;  %v812_v36 = vpop.f32.mrf.mxu0  ;;  %v2714_v32 = vpop.f32.mrf.mxu3 }
 0x333   :  { %v3502_v16 = vpop.eup %3501  ;;  %v813_v58 = vadd.f32 %v4727_v6, %v812_v36  ;;  %v2715_v63 = vadd.f32 %v4662_v1, %v2714_v32 }
 0x334   :  { %v1909_v54 = vmax.f32 %v1670_v62, 0.0  ;;  %2800 = vst.msk [vmem:[%s5473_s7 + $0x1a0] sm:$0xff] %vm2747_vm2, %v2526_v52  ;;  %3089 = vmatmul.msk.f32.gmra.mxu1 %vm1066_vm1, %v3502_v16 }
 0x335   :  { %3503 = vtanh.f32 %v813_v58  ;;  %2863 = vst.msk [vmem:[%s5473_s7 + $0x398] sm:$0xff] %vm2747_vm2, %v2715_v63 }
 0x336   :  { %3199 = vmatmul.msk.f32.gmra.mxu2 %vm1066_vm1, %v1909_v54 }
 0x339   :  { %v1672_v23 = vpop.f32.mrf.mxu1  ;;  %v2528_v19 = vpop.f32.mrf.mxu2 }
 0x33a   :  { %v1673_v21 = vadd.f32 %v4932_v38, %v1672_v23  ;;  %v2529_v3 = vadd.f32 %v4662_v1, %v2528_v19  ;;  %v815_v10 = vpop.f32.mrf.mxu0  ;;  %v2717_v11 = vpop.f32.mrf.mxu3 }
 0x33b   :  { %v3504_v24 = vpop.eup %3503  ;;  %v816_v45 = vadd.f32 %v4727_v6, %v815_v10  ;;  %v2718_v27 = vadd.f32 %v4662_v1, %v2717_v11 }
 0x33c   :  { %v1910_v5 = vmax.f32 %v1673_v21, 0.0  ;;  %2801 = vst.msk [vmem:[%s5473_s7 + $0x1a8] sm:$0xff] %vm2747_vm2, %v2529_v3  ;;  %3090 = vmatmul.msk.f32.gmra.mxu1 %vm1066_vm1, %v3504_v24 }
 0x33d   :  { %3505 = vtanh.f32 %v816_v45  ;;  %2864 = vst.msk [vmem:[%s5473_s7 + $0x3a0] sm:$0xff] %vm2747_vm2, %v2718_v27 }
 0x33e   :  { %3200 = vmatmul.msk.f32.gmra.mxu2 %vm1066_vm1, %v1910_v5 }
 0x341   :  { %v1675_v9 = vpop.f32.mrf.mxu1  ;;  %v2531_v29 = vpop.f32.mrf.mxu2 }
 0x342   :  { %v1676_v43 = vadd.f32 %v4932_v38, %v1675_v9  ;;  %v2532_v8 = vadd.f32 %v4662_v1, %v2531_v29  ;;  %v818_v15 = vpop.f32.mrf.mxu0  ;;  %v2720_v37 = vpop.f32.mrf.mxu3 }
 0x343   :  { %v3506_v57 = vpop.eup %3505  ;;  %v819_v26 = vadd.f32 %v4727_v6, %v818_v15  ;;  %v2721_v14 = vadd.f32 %v4662_v1, %v2720_v37 }
 0x344   :  { %v1911_v18 = vmax.f32 %v1676_v43, 0.0  ;;  %2802 = vst.msk [vmem:[%s5473_s7 + $0x1b0] sm:$0xff] %vm2747_vm2, %v2532_v8  ;;  %3091 = vmatmul.msk.f32.gmra.mxu1 %vm1066_vm1, %v3506_v57 }
 0x345   :  { %3507 = vtanh.f32 %v819_v26  ;;  %2865 = vst.msk [vmem:[%s5473_s7 + $0x3a8] sm:$0xff] %vm2747_vm2, %v2721_v14 }
 0x346   :  { %3201 = vmatmul.msk.f32.gmra.mxu2 %vm1066_vm1, %v1911_v18 }
 0x349   :  { %v1678_v47 = vpop.f32.mrf.mxu1  ;;  %v2534_v17 = vpop.f32.mrf.mxu2 }
 0x34a   :  { %v1679_v41 = vadd.f32 %v4932_v38, %v1678_v47  ;;  %v2535_v0 = vadd.f32 %v4662_v1, %v2534_v17  ;;  %v821_v40 = vpop.f32.mrf.mxu0  ;;  %v2723_v53 = vpop.f32.mrf.mxu3 }
 0x34b   :  { %v3508_v61 = vpop.eup %3507  ;;  %v822_v22 = vadd.f32 %v4727_v6, %v821_v40  ;;  %v2724_v30 = vadd.f32 %v4662_v1, %v2723_v53 }
 0x34c   :  { %v1912_v44 = vmax.f32 %v1679_v41, 0.0  ;;  %2803 = vst.msk [vmem:[%s5473_s7 + $0x1b8] sm:$0xff] %vm2747_vm2, %v2535_v0  ;;  %3092 = vmatmul.msk.f32.gmra.mxu1 %vm1066_vm1, %v3508_v61 }
 0x34d   :  { %3509 = vtanh.f32 %v822_v22  ;;  %2866 = vst.msk [vmem:[%s5473_s7 + $0x3b0] sm:$0xff] %vm2747_vm2, %v2724_v30 }
 0x34e   :  { %3202 = vmatmul.msk.f32.gmra.mxu2 %vm1066_vm1, %v1912_v44 }
 0x351   :  { %v1681_v48 = vpop.f32.mrf.mxu1  ;;  %v2537_v33 = vpop.f32.mrf.mxu2 }
 0x352   :  { %v1682_v39 = vadd.f32 %v4932_v38, %v1681_v48  ;;  %v2538_v28 = vadd.f32 %v4662_v1, %v2537_v33  ;;  %v824_v51 = vpop.f32.mrf.mxu0  ;;  %v2726_v31 = vpop.f32.mrf.mxu3 }
 0x353   :  { %v3510_v55 = vpop.eup %3509  ;;  %v825_v59 = vadd.f32 %v4727_v6, %v824_v51  ;;  %v2727_v4 = vadd.f32 %v4662_v1, %v2726_v31 }
 0x354   :  { %v1913_v50 = vmax.f32 %v1682_v39, 0.0  ;;  %2804 = vst.msk [vmem:[%s5473_s7 + $0x1c0] sm:$0xff] %vm2747_vm2, %v2538_v28  ;;  %3093 = vmatmul.msk.f32.gmra.mxu1 %vm1066_vm1, %v3510_v55 }
 0x355   :  { %3511 = vtanh.f32 %v825_v59  ;;  %2867 = vst.msk [vmem:[%s5473_s7 + $0x3b8] sm:$0xff] %vm2747_vm2, %v2727_v4 }
 0x356   :  { %3203 = vmatmul.msk.f32.gmra.mxu2 %vm1066_vm1, %v1913_v50 }
 0x359   :  { %v1684_v7 = vpop.f32.mrf.mxu1  ;;  %v2540_v56 = vpop.f32.mrf.mxu2 }
 0x35a   :  { %v1685_v2 = vadd.f32 %v4932_v38, %v1684_v7  ;;  %v2541_v20 = vadd.f32 %v5194_v60, %v2540_v56  ;;  %v827_v12 = vpop.f32.mrf.mxu0  ;;  %v2729_v42 = vpop.f32.mrf.mxu3 }
 0x35b   :  { %v3512_v34 = vpop.eup %3511  ;;  %v828_v1 = vadd.f32 %v4727_v6, %v827_v12  ;;  %v2730_v13 = vadd.f32 %v5194_v60, %v2729_v42 }
 0x35c   :  { %v1914_v25 = vmax.f32 %v1685_v2, 0.0  ;;  %2805 = vst.msk [vmem:[%s5473_s7 + $0x1c8] sm:$0xff] %vm2747_vm2, %v2541_v20  ;;  %3094 = vmatmul.msk.f32.gmra.mxu1 %vm1066_vm1, %v3512_v34 }
 0x35d   :  { %3513 = vtanh.f32 %v828_v1  ;;  %2868 = vst.msk [vmem:[%s5473_s7 + $0x3c0] sm:$0xff] %vm2747_vm2, %v2730_v13 }
 0x35e   :  { %3204 = vmatmul.msk.f32.gmra.mxu2 %vm1066_vm1, %v1914_v25 }
 0x361   :  { %v1687_v49 = vpop.f32.mrf.mxu1  ;;  %v2543_v46 = vpop.f32.mrf.mxu2 }
 0x362   :  { %v1688_v35 = vadd.f32 %v4932_v38, %v1687_v49  ;;  %v2544_v62 = vadd.f32 %v5194_v60, %v2543_v46  ;;  %v830_v52 = vpop.f32.mrf.mxu0  ;;  %v2732_v54 = vpop.f32.mrf.mxu3 }
 0x363   :  { %v3514_v36 = vpop.eup %3513  ;;  %v831_v16 = vadd.f32 %v4727_v6, %v830_v52  ;;  %v2733_v32 = vadd.f32 %v5194_v60, %v2732_v54 }
 0x364   :  { %v1915_v58 = vmax.f32 %v1688_v35, 0.0  ;;  %2806 = vst.msk [vmem:[%s5473_s7 + $0x1d0] sm:$0xff] %vm2747_vm2, %v2544_v62  ;;  %3095 = vmatmul.msk.f32.gmra.mxu1 %vm1066_vm1, %v3514_v36 }
 0x365   :  { %3515 = vtanh.f32 %v831_v16  ;;  %2869 = vst.msk [vmem:[%s5473_s7 + $0x3c8] sm:$0xff] %vm2747_vm2, %v2733_v32 }
 0x366   :  { %3205 = vmatmul.msk.f32.gmra.mxu2 %vm1066_vm1, %v1915_v58 }
 0x369   :  { %v1690_v63 = vpop.f32.mrf.mxu1  ;;  %v2546_v23 = vpop.f32.mrf.mxu2 }
 0x36a   :  { %v1691_v19 = vadd.f32 %v4932_v38, %v1690_v63  ;;  %v2547_v21 = vadd.f32 %v5194_v60, %v2546_v23  ;;  %v833_v3 = vpop.f32.mrf.mxu0  ;;  %v2735_v5 = vpop.f32.mrf.mxu3 }
 0x36b   :  { %v3516_v10 = vpop.eup %3515  ;;  %v834_v24 = vadd.f32 %v4727_v6, %v833_v3  ;;  %v2736_v11 = vadd.f32 %v5194_v60, %v2735_v5 }
 0x36c   :  { %v1916_v45 = vmax.f32 %v1691_v19, 0.0  ;;  %2807 = vst.msk [vmem:[%s5473_s7 + $0x1d8] sm:$0xff] %vm2747_vm2, %v2547_v21  ;;  %3096 = vmatmul.msk.f32.gmra.mxu1 %vm1066_vm1, %v3516_v10 }
 0x36d   :  { %3517 = vtanh.f32 %v834_v24  ;;  %2870 = vst.msk [vmem:[%s5473_s7 + $0x3d0] sm:$0xff] %vm2747_vm2, %v2736_v11 }
 0x36e   :  { %3206 = vmatmul.msk.f32.gmra.mxu2 %vm1066_vm1, %v1916_v45 }
 0x371   :  { %v1693_v27 = vpop.f32.mrf.mxu1  ;;  %v2549_v9 = vpop.f32.mrf.mxu2 }
 0x372   :  { %v1694_v29 = vadd.f32 %v4932_v38, %v1693_v27  ;;  %v2550_v43 = vadd.f32 %v5194_v60, %v2549_v9  ;;  %v836_v8 = vpop.f32.mrf.mxu0  ;;  %v2738_v18 = vpop.f32.mrf.mxu3 }
 0x373   :  { %v3518_v15 = vpop.eup %3517  ;;  %v837_v57 = vadd.f32 %v4727_v6, %v836_v8  ;;  %v2739_v37 = vadd.f32 %v5194_v60, %v2738_v18 }
 0x374   :  { %v1917_v26 = vmax.f32 %v1694_v29, 0.0  ;;  %2808 = vst.msk [vmem:[%s5473_s7 + $0x1e0] sm:$0xff] %vm2747_vm2, %v2550_v43  ;;  %3097 = vmatmul.msk.f32.gmra.mxu1 %vm1066_vm1, %v3518_v15 }
 0x375   :  { %3519 = vtanh.f32 %v837_v57  ;;  %2871 = vst.msk [vmem:[%s5473_s7 + $0x3d8] sm:$0xff] %vm2747_vm2, %v2739_v37 }
 0x376   :  { %3207 = vmatmul.msk.f32.gmra.mxu2 %vm1066_vm1, %v1917_v26 }
 0x379   :  { %v1696_v14 = vpop.f32.mrf.mxu1  ;;  %v2552_v47 = vpop.f32.mrf.mxu2 }
 0x37a   :  { %v1697_v6 = vadd.f32 %v4932_v38, %v1696_v14  ;;  %v2553_v17 = vadd.f32 %v5194_v60, %v2552_v47  ;;  %v2741_v40 = vpop.f32.mrf.mxu3 }
 0x37b   :  { %v3520_v41 = vpop.eup %3519  ;;  %v2742_v61 = vadd.f32 %v5194_v60, %v2741_v40 }
 0x37c   :  { %v1918_v0 = vmax.f32 %v1697_v6, 0.0  ;;  %2809 = vst.msk [vmem:[%s5473_s7 + $0x1e8] sm:$0xff] %vm2747_vm2, %v2553_v17  ;;  %3098 = vmatmul.msk.f32.gmra.mxu1 %vm1066_vm1, %v3520_v41 }
 0x37d   :  { %2872 = vst.msk [vmem:[%s5473_s7 + $0x3e0] sm:$0xff] %vm2747_vm2, %v2742_v61 }
 0x37e   :  { %3208 = vmatmul.msk.f32.gmra.mxu2 %vm1066_vm1, %v1918_v0 }
 0x381   :  { %v1699_v22 = vpop.f32.mrf.mxu1  ;;  %v2555_v44 = vpop.f32.mrf.mxu2 }
 0x382   :  { %v1700_v53 = vadd.f32 %v4932_v38, %v1699_v22  ;;  %v2556_v30 = vadd.f32 %v5194_v60, %v2555_v44  ;;  %v2744_v33 = vpop.f32.mrf.mxu3 }
 0x383   :  { %v2745_v39 = vadd.f32 %v5194_v60, %v2744_v33 }
 0x384   :  { %v1919_v48 = vmax.f32 %v1700_v53, 0.0  ;;  %2810 = vst.msk [vmem:[%s5473_s7 + $0x1f0] sm:$0xff] %vm2747_vm2, %v2556_v30 }
 0x385   :  { %2873 = vst.msk [vmem:[%s5473_s7 + $0x3e8] sm:$0xff] %vm2747_vm2, %v2745_v39 }
 0x386   :  { %3209 = vmatmul.msk.f32.gmra.mxu2 %vm1066_vm1, %v1919_v48 }
 0x389   :  { %v1702_v28 = vpop.f32.mrf.mxu1  ;;  %v2558_v51 = vpop.f32.mrf.mxu2 }
 0x38a   :  { %v1703_v55 = vadd.f32 %v4932_v38, %v1702_v28  ;;  %v2559_v59 = vadd.f32 %v5194_v60, %v2558_v51 }
 0x38c   :  { %v1920_v50 = vmax.f32 %v1703_v55, 0.0  ;;  %2811 = vst.msk [vmem:[%s5473_s7 + $0x1f8] sm:$0xff] %vm2747_vm2, %v2559_v59 }
 0x38e   :  { %3210 = vmatmul.msk.f32.gmra.mxu2 %vm1066_vm1, %v1920_v50 }
 0x391   :  { %v1705_v31 = vpop.f32.mrf.mxu1  ;;  %v2561_v4 = vpop.f32.mrf.mxu2 }
 0x392   :  { %v1706_v7 = vadd.f32 %v4932_v38, %v1705_v31  ;;  %v2562_v56 = vadd.f32 %v5194_v60, %v2561_v4 }
 0x394   :  { %v1921_v2 = vmax.f32 %v1706_v7, 0.0  ;;  %2812 = vst.msk [vmem:[%s5473_s7 + $0x200] sm:$0xff] %vm2747_vm2, %v2562_v56 }
 0x396   :  { %3211 = vmatmul.msk.f32.gmra.mxu2 %vm1066_vm1, %v1921_v2 }
 0x399   :  { %v1708_v20 = vpop.f32.mrf.mxu1  ;;  %v2564_v12 = vpop.f32.mrf.mxu2 }
 0x39a   :  { %v1709_v34 = vadd.f32 %v4932_v38, %v1708_v20  ;;  %v2565_v1 = vadd.f32 %v5194_v60, %v2564_v12 }
 0x39c   :  { %v1922_v25 = vmax.f32 %v1709_v34, 0.0  ;;  %2813 = vst.msk [vmem:[%s5473_s7 + $0x208] sm:$0xff] %vm2747_vm2, %v2565_v1 }
 0x39e   :  { %3212 = vmatmul.msk.f32.gmra.mxu2 %vm1066_vm1, %v1922_v25 }
 0x3a1   :  { %v1711_v42 = vpop.f32.mrf.mxu1  ;;  %v2567_v13 = vpop.f32.mrf.mxu2 }
 0x3a2   :  { %v1712_v49 = vadd.f32 %v4932_v38, %v1711_v42  ;;  %v2568_v46 = vadd.f32 %v5194_v60, %v2567_v13 }
 0x3a4   :  { %v1923_v35 = vmax.f32 %v1712_v49, 0.0  ;;  %2814 = vst.msk [vmem:[%s5473_s7 + $0x210] sm:$0xff] %vm2747_vm2, %v2568_v46 }
 0x3a6   :  { %3213 = vmatmul.msk.f32.gmra.mxu2 %vm1066_vm1, %v1923_v35 }
 0x3a9   :  { %v1714_v62 = vpop.f32.mrf.mxu1  ;;  %v2570_v52 = vpop.f32.mrf.mxu2 }
 0x3aa   :  { %v1715_v36 = vadd.f32 %v4932_v38, %v1714_v62  ;;  %v2571_v16 = vadd.f32 %v5194_v60, %v2570_v52 }
 0x3ac   :  { %v1924_v58 = vmax.f32 %v1715_v36, 0.0  ;;  %2815 = vst.msk [vmem:[%s5473_s7 + $0x218] sm:$0xff] %vm2747_vm2, %v2571_v16 }
 0x3ae   :  { %3214 = vmatmul.msk.f32.gmra.mxu2 %vm1066_vm1, %v1924_v58 }
 0x3b1   :  { %v1717_v54 = vpop.f32.mrf.mxu1  ;;  %v2573_v32 = vpop.f32.mrf.mxu2 }
 0x3b2   :  { %v1718_v63 = vadd.f32 %v4932_v38, %v1717_v54  ;;  %v2574_v23 = vadd.f32 %v5194_v60, %v2573_v32 }
 0x3b4   :  { %v1925_v19 = vmax.f32 %v1718_v63, 0.0  ;;  %2816 = vst.msk [vmem:[%s5473_s7 + $0x220] sm:$0xff] %vm2747_vm2, %v2574_v23 }
 0x3b6   :  { %3215 = vmatmul.msk.f32.gmra.mxu2 %vm1066_vm1, %v1925_v19 }
 0x3b9   :  { %v1720_v21 = vpop.f32.mrf.mxu1  ;;  %v2576_v3 = vpop.f32.mrf.mxu2 }
 0x3ba   :  { %v1721_v10 = vadd.f32 %v4932_v38, %v1720_v21  ;;  %v2577_v24 = vadd.f32 %v5194_v60, %v2576_v3 }
 0x3bc   :  { %v1926_v45 = vmax.f32 %v1721_v10, 0.0  ;;  %2817 = vst.msk [vmem:[%s5473_s7 + $0x228] sm:$0xff] %vm2747_vm2, %v2577_v24 }
 0x3be   :  { %3216 = vmatmul.msk.f32.gmra.mxu2 %vm1066_vm1, %v1926_v45 }
 0x3c1   :  { %v1723_v5 = vpop.f32.mrf.mxu1  ;;  %v2579_v11 = vpop.f32.mrf.mxu2 }
 0x3c2   :  { %v1724_v27 = vadd.f32 %v4932_v38, %v1723_v5  ;;  %v2580_v9 = vadd.f32 %v5194_v60, %v2579_v11 }
 0x3c4   :  { %v1927_v29 = vmax.f32 %v1724_v27, 0.0  ;;  %2818 = vst.msk [vmem:[%s5473_s7 + $0x230] sm:$0xff] %vm2747_vm2, %v2580_v9 }
 0x3c6   :  { %3217 = vmatmul.msk.f32.gmra.mxu2 %vm1066_vm1, %v1927_v29 }
 0x3c9   :  { %v1726_v43 = vpop.f32.mrf.mxu1  ;;  %v2582_v8 = vpop.f32.mrf.mxu2 }
 0x3ca   :  { %v1727_v15 = vadd.f32 %v4932_v38, %v1726_v43  ;;  %v2583_v57 = vadd.f32 %v5194_v60, %v2582_v8 }
 0x3cc   :  { %v1928_v26 = vmax.f32 %v1727_v15, 0.0  ;;  %2819 = vst.msk [vmem:[%s5473_s7 + $0x238] sm:$0xff] %vm2747_vm2, %v2583_v57 }
 0x3ce   :  { %3218 = vmatmul.msk.f32.gmra.mxu2 %vm1066_vm1, %v1928_v26 }
 0x3d1   :  { %v1729_v18 = vpop.f32.mrf.mxu1  ;;  %v2585_v37 = vpop.f32.mrf.mxu2 }
 0x3d2   :  { %v1730_v14 = vadd.f32 %v4932_v38, %v1729_v18  ;;  %v2586_v47 = vadd.f32 %v5194_v60, %v2585_v37 }
 0x3d4   :  { %v1929_v6 = vmax.f32 %v1730_v14, 0.0  ;;  %2820 = vst.msk [vmem:[%s5473_s7 + $0x240] sm:$0xff] %vm2747_vm2, %v2586_v47 }
 0x3d6   :  { %3219 = vmatmul.msk.f32.gmra.mxu2 %vm1066_vm1, %v1929_v6 }
 0x3d9   :  { %v1732_v17 = vpop.f32.mrf.mxu1  ;;  %v2588_v41 = vpop.f32.mrf.mxu2 }
 0x3da   :  { %v1733_v0 = vadd.f32 %v4932_v38, %v1732_v17  ;;  %v2589_v40 = vadd.f32 %v5194_v60, %v2588_v41 }
 0x3dc   :  { %v1930_v61 = vmax.f32 %v1733_v0, 0.0  ;;  %2821 = vst.msk [vmem:[%s5473_s7 + $0x248] sm:$0xff] %vm2747_vm2, %v2589_v40 }
 0x3de   :  { %3220 = vmatmul.msk.f32.gmra.mxu2 %vm1066_vm1, %v1930_v61 }
 0x3e1   :  { %v1735_v22 = vpop.f32.mrf.mxu1  ;;  %v2591_v44 = vpop.f32.mrf.mxu2 }
 0x3e2   :  { %v1736_v53 = vadd.f32 %v4932_v38, %v1735_v22  ;;  %v2592_v30 = vadd.f32 %v5194_v60, %v2591_v44 }
 0x3e4   :  { %v1931_v48 = vmax.f32 %v1736_v53, 0.0  ;;  %2822 = vst.msk [vmem:[%s5473_s7 + $0x250] sm:$0xff] %vm2747_vm2, %v2592_v30 }
 0x3e6   :  { %3221 = vmatmul.msk.f32.gmra.mxu2 %vm1066_vm1, %v1931_v48 }
 0x3e9   :  { %v1738_v33 = vpop.f32.mrf.mxu1  ;;  %v2594_v39 = vpop.f32.mrf.mxu2 }
 0x3ea   :  { %v1739_v28 = vadd.f32 %v4932_v38, %v1738_v33  ;;  %v2595_v51 = vadd.f32 %v5194_v60, %v2594_v39 }
 0x3ec   :  { %v1932_v55 = vmax.f32 %v1739_v28, 0.0  ;;  %2823 = vst.msk [vmem:[%s5473_s7 + $0x258] sm:$0xff] %vm2747_vm2, %v2595_v51 }
 0x3ee   :  { %3222 = vmatmul.msk.f32.gmra.mxu2 %vm1066_vm1, %v1932_v55 }
 0x3f1   :  { %v1741_v59 = vpop.f32.mrf.mxu1  ;;  %v2597_v50 = vpop.f32.mrf.mxu2 }
 0x3f2   :  { %v1742_v31 = vadd.f32 %v4932_v38, %v1741_v59  ;;  %v2598_v4 = vadd.f32 %v5194_v60, %v2597_v50 }
 0x3f4   :  { %v1933_v7 = vmax.f32 %v1742_v31, 0.0  ;;  %2824 = vst.msk [vmem:[%s5473_s7 + $0x260] sm:$0xff] %vm2747_vm2, %v2598_v4 }
 0x3f6   :  { %3223 = vmatmul.msk.f32.gmra.mxu2 %vm1066_vm1, %v1933_v7 }
 0x3f9   :  { %v1744_v56 = vpop.f32.mrf.mxu1  ;;  %v2600_v2 = vpop.f32.mrf.mxu2 }
 0x3fa   :  { %v1745_v20 = vadd.f32 %v4932_v38, %v1744_v56  ;;  %v2601_v12 = vadd.f32 %v5194_v60, %v2600_v2 }
 0x3fc   :  { %v1934_v34 = vmax.f32 %v1745_v20, 0.0  ;;  %2825 = vst.msk [vmem:[%s5473_s7 + $0x268] sm:$0xff] %vm2747_vm2, %v2601_v12 }
 0x3fe   :  { %3224 = vmatmul.msk.f32.gmra.mxu2 %vm1066_vm1, %v1934_v34 }
 0x401   :  { %v2603_v1 = vpop.f32.mrf.mxu2 }
 0x402   :  { %v2604_v25 = vadd.f32 %v5194_v60, %v2603_v1 }
 0x404   :  { %2826 = vst.msk [vmem:[%s5473_s7 + $0x270] sm:$0xff] %vm2747_vm2, %v2604_v25 }
 0x409   :  { %v2606_v42 = vpop.f32.mrf.mxu2 }
 0x40a   :  { %v2607_v38 = vadd.f32 %v5194_v60, %v2606_v42 }
 0x40c   :  { %2827 = vst.msk [vmem:[%s5473_s7 + $0x278] sm:$0xff] %vm2747_vm2, %v2607_v38 }
 0x411   :  { %v2609_v13 = vpop.f32.mrf.mxu2 }
 0x412   :  { %v2610_v49 = vadd.f32 %v5194_v60, %v2609_v13 }
 0x414   :  { %2828 = vst.msk [vmem:[%s5473_s7 + $0x280] sm:$0xff] %vm2747_vm2, %v2610_v49 }
 0x419   :  { %v2612_v46 = vpop.f32.mrf.mxu2 }
 0x41a   :  { %v2613_v35 = vadd.f32 %v5194_v60, %v2612_v46 }
 0x41c   :  { %2829 = vst.msk [vmem:[%s5473_s7 + $0x288] sm:$0xff] %vm2747_vm2, %v2613_v35 }
 0x421   :  { %v2615_v62 = vpop.f32.mrf.mxu2 }
 0x422   :  { %v2616_v52 = vadd.f32 %v5194_v60, %v2615_v62 }
 0x424   :  { %2830 = vst.msk [vmem:[%s5473_s7 + $0x290] sm:$0xff] %vm2747_vm2, %v2616_v52 }
 0x429   :  { %v2618_v36 = vpop.f32.mrf.mxu2 }
 0x42a   :  { %v2619_v16 = vadd.f32 %v5194_v60, %v2618_v36 }
 0x42c   :  { %2831 = vst.msk [vmem:[%s5473_s7 + $0x298] sm:$0xff] %vm2747_vm2, %v2619_v16 }
 0x431   :  { %v2621_v58 = vpop.f32.mrf.mxu2 }
 0x432   :  { %v2622_v54 = vadd.f32 %v5194_v60, %v2621_v58 }
 0x434   :  { %2832 = vst.msk [vmem:[%s5473_s7 + $0x2a0] sm:$0xff] %vm2747_vm2, %v2622_v54 }
 0x439   :  { %v2624_v32 = vpop.f32.mrf.mxu2 }
 0x43a   :  { %v2625_v63 = vadd.f32 %v5194_v60, %v2624_v32 }
 0x43c   :  { %2833 = vst.msk [vmem:[%s5473_s7 + $0x2a8] sm:$0xff] %vm2747_vm2, %v2625_v63 }
 0x441   :  { %v2627_v23 = vpop.f32.mrf.mxu2 }
 0x442   :  { %v2628_v19 = vadd.f32 %v5194_v60, %v2627_v23 }
 0x444   :  { %2834 = vst.msk [vmem:[%s5473_s7 + $0x2b0] sm:$0xff] %vm2747_vm2, %v2628_v19 }
 0x449   :  { %v2630_v21 = vpop.f32.mrf.mxu2 }
 0x44a   :  { %v2631_v3 = vadd.f32 %v5194_v60, %v2630_v21 }
 0x44c   :  { %2835 = vst.msk [vmem:[%s5473_s7 + $0x2b8] sm:$0xff] %vm2747_vm2, %v2631_v3 }
 0x451   :  { %v2633_v10 = vpop.f32.mrf.mxu2 }
 0x452   :  { %v2634_v24 = vadd.f32 %v5194_v60, %v2633_v10 }
 0x454   :  { %2836 = vst.msk [vmem:[%s5473_s7 + $0x2c0] sm:$0xff] %vm2747_vm2, %v2634_v24 }
 0x459   :  { %v2636_v45 = vpop.f32.mrf.mxu2 }
 0x45a   :  { %v2637_v5 = vadd.f32 %v5194_v60, %v2636_v45 }
 0x45c   :  { %2837 = vst.msk [vmem:[%s5473_s7 + $0x2c8] sm:$0xff] %vm2747_vm2, %v2637_v5 }
 0x461   :  { %v2639_v11 = vpop.f32.mrf.mxu2 }
 0x462   :  { %v2640_v27 = vadd.f32 %v5194_v60, %v2639_v11 }
 0x464   :  { %2838 = vst.msk [vmem:[%s5473_s7 + $0x2d0] sm:$0xff] %vm2747_vm2, %v2640_v27 }
 0x469   :  { %v2642_v9 = vpop.f32.mrf.mxu2 }
 0x46a   :  { %v2643_v29 = vadd.f32 %v5194_v60, %v2642_v9 }
 0x46c   :  { %2839 = vst.msk [vmem:[%s5473_s7 + $0x2d8] sm:$0xff] %vm2747_vm2, %v2643_v29 }
 0x471   :  { %v2645_v43 = vpop.f32.mrf.mxu2 }
 0x472   :  { %v2646_v8 = vadd.f32 %v5194_v60, %v2645_v43 }
 0x474   :  { %2840 = vst.msk [vmem:[%s5473_s7 + $0x2e0] sm:$0xff] %vm2747_vm2, %v2646_v8 }
 0x479   :  { %v2648_v15 = vpop.f32.mrf.mxu2 }
 0x47a   :  { %v2649_v57 = vadd.f32 %v5194_v60, %v2648_v15 }
 0x47c   :  { %2841 = vst.msk [vmem:[%s5473_s7 + $0x2e8] sm:$0xff] %vm2747_vm2, %v2649_v57 }
 0x481   :  { %v2651_v26 = vpop.f32.mrf.mxu2 }
 0x482   :  { %v2652_v18 = vadd.f32 %v5194_v60, %v2651_v26 }
 0x484   :  { %2842 = vst.msk [vmem:[%s5473_s7 + $0x2f0] sm:$0xff] %vm2747_vm2, %v2652_v18 }

</bundles_post_ra>
